<compile_context>
chip_gen: v7x
topology: tpu7x:2x2x1
jax: 0.10.0
libtpu: 0.0.40
codegen_flags: <defaults>
</compile_context>

<pallas_src>
import jax
import jax.numpy as jnp
from jax.experimental import pallas as pl
from jax.experimental.pallas import tpu as pltpu

_NEG_SLOPE = 0.01  # torch F.leaky_relu default negative_slope


def _leaky_relu(v):
    return jnp.where(v > 0, v, _NEG_SLOPE * v)


def net3_kernel(x_ref, t_ref,
                w1_0, b1_0, w2_0, b2_0, w3_0, b3_0, w4_0, b4_0,
                w1_1, b1_1, w2_1, b2_1, w3_1, b3_1, w4_1, b4_1,
                y_ref):
    # In-kernel bf16 cast of the x tile (no separate wrapper cast pass).
    x = x_ref[...].astype(jnp.bfloat16)  # (TILE_N, hid)

    def head(w1, b1, w2, b2, w3, b3, w4r, b4):
        # Hoist bias loads once per tile (JAX doesn't CSE broadcast_in_dim).
        b1v, b2v, b3v = b1[...], b2[...], b3[...]
        h = _leaky_relu(
            jnp.dot(x, w1[...], preferred_element_type=jnp.float32) + b1v)
        # dropout (eval mode) == identity
        h = _leaky_relu(
            jnp.dot(h.astype(jnp.bfloat16), w2[...],
                    preferred_element_type=jnp.float32) + b2v)
        h = _leaky_relu(
            jnp.dot(h.astype(jnp.bfloat16), w3[...],
                    preferred_element_type=jnp.float32) + b3v)
        # 100 -> 1 layer as (1,100) . (TILE_N,100)^T: contracting the last
        # dims yields a (1, TILE_N) row directly in lane-major layout, so the
        # final select/store are fully lane-dense with zero relayouts.
        y_row = jax.lax.dot_general(
            w4r[...], h.astype(jnp.bfloat16),
            dimension_numbers=(((1,), (1,)), ((), ())),
            preferred_element_type=jnp.float32)
        return y_row + b4[...]                       # (1, TILE_N) f32

    y0 = head(w1_0, b1_0, w2_0, b2_0, w3_0, b3_0, w4_0, b4_0)
    y1 = head(w1_1, b1_1, w2_1, b2_1, w3_1, b3_1, w4_1, b4_1)

    # Lane-dense select + store: t block and output block are (1, TILE_N).
    y_ref[...] = jnp.where(t_ref[...] > 0.0, y1, y0)


def make_net3_params(hid_dim, key):
    """nn.init.normal_(w, 0, 0.001) for all weights and biases, both heads.
    Weights are stored (in, out) so the kernel computes x @ W + b. All f32."""
    dims = [(hid_dim, 200), (200, 200), (200, 100), (100, 1)]
    params = []
    for _head in range(2):
        for (din, dout) in dims:
            key, kw, kb = jax.random.split(key, 3)
            w = 0.001 * jax.random.normal(kw, (din, dout), dtype=jnp.float32)
            b = 0.001 * jax.random.normal(kb, (1, dout), dtype=jnp.float32)
            params += [w, b]
    return params  # [w1_0, b1_0, ..., w4_0, b4_0, w1_1, b1_1, ..., w4_1, b4_1]


def _prep_params(params):
    """Cast weights to bf16 (MXU operands), keep biases f32, and reshape the
    (100, 1) output weight to a (1, 100) bf16 row (lhs of the transposed
    output-layer contraction)."""
    prepped = []
    for h in range(2):
        w1, b1, w2, b2, w3, b3, w4, b4 = params[8 * h: 8 * h + 8]
        prepped += [w1.astype(jnp.bfloat16), b1,
                    w2.astype(jnp.bfloat16), b2,
                    w3.astype(jnp.bfloat16), b3,
                    w4.reshape(1, -1).astype(jnp.bfloat16), b4]
    return prepped


def _round_up(v, m):
    return ((v + m - 1) // m) * m


def net3_forward(x, t, params, tile_n=2048):
    """x: (N, hid_dim) f32, t: (N,) f32/int -> y: (N,) f32 (eval-mode Net3)."""
    n, hid = x.shape
    x = jnp.asarray(x, jnp.float32)                      # no-op if already f32
    t_row = jnp.asarray(t, jnp.float32).reshape(1, -1)   # lane-dense treatment

    # Batch tile: big enough to amortize ~0.35 us/step overhead and per-step
    # MXU weight pushes, small enough that per-step f32 intermediates stay at
    # a few MiB (safe on v7x's 64 MiB VMEM / 32 MiB scoped default).
    # Lane-dense (1, tile) t/y blocks require tile % 128 == 0 (or tile == n).
    tile = min(tile_n, _round_up(n, 128))
    # Keep >= 2 grid steps when there is enough work so v7x megacore can
    # shard the "parallel" batch axis across both TensorCores.
    if pl.cdiv(n, tile) < 2 and n > 256:
        tile = _round_up(pl.cdiv(n, 2), 128)
    grid_n = pl.cdiv(n, tile)   # ragged tail block is masked by Pallas

    prepped = _prep_params(params)

    x_map = lambda i: (i, 0)
    row_map = lambda i: (0, i)
    const_map = lambda i: (0, 0)      # weights stay resident across all tiles
    in_specs = ([pl.BlockSpec((tile, hid), x_map),
                 pl.BlockSpec((1, tile), row_map)]
                + [pl.BlockSpec(p.shape, const_map) for p in prepped])
    out_specs = pl.BlockSpec((1, tile), row_map)

    flops = 2 * n * 2 * (hid * 200 + 200 * 200 + 200 * 100 + 100 * 1)
    bytes_accessed = (x.size * 4 + 2 * n * 4
                      + sum(int(p.size) * p.dtype.itemsize for p in prepped))
    cost = pl.CostEstimate(flops=int(flops), transcendentals=0,
                           bytes_accessed=int(bytes_accessed))

    y_row = pl.pallas_call(
        net3_kernel,
        out_shape=jax.ShapeDtypeStruct((1, n), jnp.float32),
        grid_spec=pltpu.PrefetchScalarGridSpec(
            num_scalar_prefetch=0,
            grid=(grid_n,),
            in_specs=in_specs,
            out_specs=out_specs,
        ),
        compiler_params=pltpu.CompilerParams(
            dimension_semantics=("parallel",)),  # megacore shards batch tiles
        cost_estimate=cost,
    )(x, t_row, *prepped)

    return y_row[0]   # (N,), matches torch .view(-1) + where


def net3_reference(x, t, params):
    """Pure-JAX f32 reference for validation (eval-mode Net3)."""
    def head(p):
        h = x
        for i in range(3):
            z = h @ p[2 * i] + p[2 * i + 1]
            h = jnp.where(z > 0, z, _NEG_SLOPE * z)
        return (h @ p[6] + p[7]).reshape(-1)
    return jnp.where(t > 0, head(params[8:]), head(params[:8]))


if __name__ == "__main__":
    hid_dim = 32
    key = jax.random.PRNGKey(0)
    kx, kt, kp, kx2, kt2, kx3, kt3 = jax.random.split(key, 7)
    params = make_net3_params(hid_dim, kp)

    # Small single-tile test (batch = 8).
    n_small = 8
    x = jax.random.normal(kx, (n_small, hid_dim), dtype=jnp.float32)
    t = (jax.random.uniform(kt, (n_small,)) > 0.5).astype(jnp.float32)
    y = jax.block_until_ready(net3_forward(x, t, params))
    y_ref = net3_reference(x, t, params)
    assert y.shape == (n_small,)
    assert jnp.allclose(y, y_ref, atol=2e-5, rtol=1e-3), \
        float(jnp.max(jnp.abs(y - y_ref)))

    # Mid test: exercises the megacore grid-split heuristic + ragged tail
    # (1000 rows -> tile 512, grid 2, tail block of 488 rows).
    n_mid = 1000
    xm = jax.random.normal(kx2, (n_mid, hid_dim), dtype=jnp.float32)
    tm = (jax.random.uniform(kt2, (n_mid,)) > 0.5).astype(jnp.float32)
    ym = jax.block_until_ready(net3_forward(xm, tm, params))
    ym_ref = net3_reference(xm, tm, params)
    assert ym.shape == (n_mid,)
    assert jnp.allclose(ym, ym_ref, atol=2e-5, rtol=1e-3), \
        float(jnp.max(jnp.abs(ym - ym_ref)))

    # Larger test: multi-tile at the default tile size with a ragged tail
    # (3000 rows -> tile 2048, grid 2, tail block of 952 rows).
    n_big = 3000
    xb = jax.random.normal(kx3, (n_big, hid_dim), dtype=jnp.float32)
    tb = (jax.random.uniform(kt3, (n_big,)) > 0.5).astype(jnp.float32)
    yb = jax.block_until_ready(net3_forward(xb, tb, params))
    yb_ref = net3_reference(xb, tb, params)
    assert yb.shape == (n_big,)
    assert jnp.allclose(yb, yb_ref, atol=2e-5, rtol=1e-3), \
        float(jnp.max(jnp.abs(yb - yb_ref)))

    print("KERNEL_OK")
</pallas_src>

<mosaic_0001>
module attributes {stable_mosaic.version = 11 : i64} {
  func.func @net3_kernel(%arg0: i32, %arg1: memref<128x32xf32, #tpu.memory_space<vmem>>, %arg2: memref<1x128xf32, #tpu.memory_space<vmem>>, %arg3: memref<32x200xbf16, #tpu.memory_space<vmem>>, %arg4: memref<1x200xf32, #tpu.memory_space<vmem>>, %arg5: memref<200x200xbf16, #tpu.memory_space<vmem>>, %arg6: memref<1x200xf32, #tpu.memory_space<vmem>>, %arg7: memref<200x100xbf16, #tpu.memory_space<vmem>>, %arg8: memref<1x100xf32, #tpu.memory_space<vmem>>, %arg9: memref<1x100xbf16, #tpu.memory_space<vmem>>, %arg10: memref<1x1xf32, #tpu.memory_space<vmem>>, %arg11: memref<32x200xbf16, #tpu.memory_space<vmem>>, %arg12: memref<1x200xf32, #tpu.memory_space<vmem>>, %arg13: memref<200x200xbf16, #tpu.memory_space<vmem>>, %arg14: memref<1x200xf32, #tpu.memory_space<vmem>>, %arg15: memref<200x100xbf16, #tpu.memory_space<vmem>>, %arg16: memref<1x100xf32, #tpu.memory_space<vmem>>, %arg17: memref<1x100xbf16, #tpu.memory_space<vmem>>, %arg18: memref<1x1xf32, #tpu.memory_space<vmem>>, %arg19: memref<1x128xf32, #tpu.memory_space<vmem>>) attributes {dimension_semantics = [#tpu.dimension_semantics<parallel>], iteration_bounds = array<i64: 1>, scalar_prefetch = 0 : i64, scratch_operands = 0 : i64, tpu.core_type = #tpu.core_type<tc>, window_params = [{transform_indices = @transform_0, window_bounds = array<i64: 128, 32>}, {transform_indices = @transform_1, window_bounds = array<i64: 1, 128>}, {pipeline_mode = #tpu.pipeline_mode<synchronous>, transform_indices = @transform_2, window_bounds = array<i64: 32, 200>}, {pipeline_mode = #tpu.pipeline_mode<synchronous>, transform_indices = @transform_3, window_bounds = array<i64: 1, 200>}, {pipeline_mode = #tpu.pipeline_mode<synchronous>, transform_indices = @transform_4, window_bounds = array<i64: 200, 200>}, {pipeline_mode = #tpu.pipeline_mode<synchronous>, transform_indices = @transform_5, window_bounds = array<i64: 1, 200>}, {pipeline_mode = #tpu.pipeline_mode<synchronous>, transform_indices = @transform_6, window_bounds = array<i64: 200, 100>}, {pipeline_mode = #tpu.pipeline_mode<synchronous>, transform_indices = @transform_7, window_bounds = array<i64: 1, 100>}, {pipeline_mode = #tpu.pipeline_mode<synchronous>, transform_indices = @transform_8, window_bounds = array<i64: 1, 100>}, {pipeline_mode = #tpu.pipeline_mode<synchronous>, transform_indices = @transform_9, window_bounds = array<i64: 1, 1>}, {pipeline_mode = #tpu.pipeline_mode<synchronous>, transform_indices = @transform_10, window_bounds = array<i64: 32, 200>}, {pipeline_mode = #tpu.pipeline_mode<synchronous>, transform_indices = @transform_11, window_bounds = array<i64: 1, 200>}, {pipeline_mode = #tpu.pipeline_mode<synchronous>, transform_indices = @transform_12, window_bounds = array<i64: 200, 200>}, {pipeline_mode = #tpu.pipeline_mode<synchronous>, transform_indices = @transform_13, window_bounds = array<i64: 1, 200>}, {pipeline_mode = #tpu.pipeline_mode<synchronous>, transform_indices = @transform_14, window_bounds = array<i64: 200, 100>}, {pipeline_mode = #tpu.pipeline_mode<synchronous>, transform_indices = @transform_15, window_bounds = array<i64: 1, 100>}, {pipeline_mode = #tpu.pipeline_mode<synchronous>, transform_indices = @transform_16, window_bounds = array<i64: 1, 100>}, {pipeline_mode = #tpu.pipeline_mode<synchronous>, transform_indices = @transform_17, window_bounds = array<i64: 1, 1>}, {transform_indices = @transform_18, window_bounds = array<i64: 1, 128>}]} {
    %c0 = arith.constant 0 : index
    %c0_0 = arith.constant 0 : index
    %0 = vector.load %arg1[%c0, %c0_0] : memref<128x32xf32, #tpu.memory_space<vmem>>, vector<128x32xf32>
    %1 = arith.truncf %0 : vector<128x32xf32> to vector<128x32xbf16>
    %c0_1 = arith.constant 0 : index
    %c0_2 = arith.constant 0 : index
    %2 = vector.load %arg4[%c0_1, %c0_2] : memref<1x200xf32, #tpu.memory_space<vmem>>, vector<1x200xf32>
    %c0_3 = arith.constant 0 : index
    %c0_4 = arith.constant 0 : index
    %3 = vector.load %arg6[%c0_3, %c0_4] : memref<1x200xf32, #tpu.memory_space<vmem>>, vector<1x200xf32>
    %c0_5 = arith.constant 0 : index
    %c0_6 = arith.constant 0 : index
    %4 = vector.load %arg8[%c0_5, %c0_6] : memref<1x100xf32, #tpu.memory_space<vmem>>, vector<1x100xf32>
    %c0_7 = arith.constant 0 : index
    %c0_8 = arith.constant 0 : index
    %5 = vector.load %arg3[%c0_7, %c0_8] : memref<32x200xbf16, #tpu.memory_space<vmem>>, vector<32x200xbf16>
    %cst = arith.constant dense<0.000000e+00> : vector<128x200xf32>
    %6 = tpu.matmul %1, %5, %cst {dimension_numbers = #tpu.dot_dimension_numbers<[1], [0], [0], [1], [0, 0, 1, 1], [], []>} : vector<128x32xbf16>, vector<32x200xbf16>, vector<128x200xf32> -> vector<128x200xf32>
    %7 = vector.broadcast %2 : vector<1x200xf32> to vector<128x200xf32>
    %8 = arith.addf %6, %7 : vector<128x200xf32>
    %cst_9 = arith.constant 0.000000e+00 : f32
    %9 = vector.broadcast %cst_9 : f32 to vector<128x200xf32>
    %10 = arith.cmpf ogt, %8, %9 : vector<128x200xf32>
    %cst_10 = arith.constant 0.00999999977 : f32
    %11 = vector.broadcast %cst_10 : f32 to vector<128x200xf32>
    %12 = arith.mulf %11, %8 : vector<128x200xf32>
    %13 = arith.select %10, %8, %12 : vector<128x200xi1>, vector<128x200xf32>
    %14 = arith.truncf %13 : vector<128x200xf32> to vector<128x200xbf16>
    %c0_11 = arith.constant 0 : index
    %c0_12 = arith.constant 0 : index
    %15 = vector.load %arg5[%c0_11, %c0_12] : memref<200x200xbf16, #tpu.memory_space<vmem>>, vector<200x200xbf16>
    %cst_13 = arith.constant dense<0.000000e+00> : vector<128x200xf32>
    %16 = tpu.matmul %14, %15, %cst_13 {dimension_numbers = #tpu.dot_dimension_numbers<[1], [0], [0], [1], [0, 0, 1, 1], [], []>} : vector<128x200xbf16>, vector<200x200xbf16>, vector<128x200xf32> -> vector<128x200xf32>
    %17 = vector.broadcast %3 : vector<1x200xf32> to vector<128x200xf32>
    %18 = arith.addf %16, %17 : vector<128x200xf32>
    %cst_14 = arith.constant 0.000000e+00 : f32
    %19 = vector.broadcast %cst_14 : f32 to vector<128x200xf32>
    %20 = arith.cmpf ogt, %18, %19 : vector<128x200xf32>
    %cst_15 = arith.constant 0.00999999977 : f32
    %21 = vector.broadcast %cst_15 : f32 to vector<128x200xf32>
    %22 = arith.mulf %21, %18 : vector<128x200xf32>
    %23 = arith.select %20, %18, %22 : vector<128x200xi1>, vector<128x200xf32>
    %24 = arith.truncf %23 : vector<128x200xf32> to vector<128x200xbf16>
    %c0_16 = arith.constant 0 : index
    %c0_17 = arith.constant 0 : index
    %25 = vector.load %arg7[%c0_16, %c0_17] : memref<200x100xbf16, #tpu.memory_space<vmem>>, vector<200x100xbf16>
    %cst_18 = arith.constant dense<0.000000e+00> : vector<128x100xf32>
    %26 = tpu.matmul %24, %25, %cst_18 {dimension_numbers = #tpu.dot_dimension_numbers<[1], [0], [0], [1], [0, 0, 1, 1], [], []>} : vector<128x200xbf16>, vector<200x100xbf16>, vector<128x100xf32> -> vector<128x100xf32>
    %27 = vector.broadcast %4 : vector<1x100xf32> to vector<128x100xf32>
    %28 = arith.addf %26, %27 : vector<128x100xf32>
    %cst_19 = arith.constant 0.000000e+00 : f32
    %29 = vector.broadcast %cst_19 : f32 to vector<128x100xf32>
    %30 = arith.cmpf ogt, %28, %29 : vector<128x100xf32>
    %cst_20 = arith.constant 0.00999999977 : f32
    %31 = vector.broadcast %cst_20 : f32 to vector<128x100xf32>
    %32 = arith.mulf %31, %28 : vector<128x100xf32>
    %33 = arith.select %30, %28, %32 : vector<128x100xi1>, vector<128x100xf32>
    %c0_21 = arith.constant 0 : index
    %c0_22 = arith.constant 0 : index
    %34 = vector.load %arg9[%c0_21, %c0_22] : memref<1x100xbf16, #tpu.memory_space<vmem>>, vector<1x100xbf16>
    %35 = arith.truncf %33 : vector<128x100xf32> to vector<128x100xbf16>
    %cst_23 = arith.constant dense<0.000000e+00> : vector<1x128xf32>
    %36 = tpu.matmul %34, %35, %cst_23 {dimension_numbers = #tpu.dot_dimension_numbers<[1], [1], [0], [0], [0, 0, 1, 0], [], []>} : vector<1x100xbf16>, vector<128x100xbf16>, vector<1x128xf32> -> vector<1x128xf32>
    %c0_24 = arith.constant 0 : index
    %c0_25 = arith.constant 0 : index
    %37 = vector.load %arg10[%c0_24, %c0_25] : memref<1x1xf32, #tpu.memory_space<vmem>>, vector<1x1xf32>
    %38 = vector.broadcast %37 : vector<1x1xf32> to vector<1x128xf32>
    %39 = arith.addf %36, %38 : vector<1x128xf32>
    %c0_26 = arith.constant 0 : index
    %c0_27 = arith.constant 0 : index
    %40 = vector.load %arg12[%c0_26, %c0_27] : memref<1x200xf32, #tpu.memory_space<vmem>>, vector<1x200xf32>
    %c0_28 = arith.constant 0 : index
    %c0_29 = arith.constant 0 : index
    %41 = vector.load %arg14[%c0_28, %c0_29] : memref<1x200xf32, #tpu.memory_space<vmem>>, vector<1x200xf32>
    %c0_30 = arith.constant 0 : index
    %c0_31 = arith.constant 0 : index
    %42 = vector.load %arg16[%c0_30, %c0_31] : memref<1x100xf32, #tpu.memory_space<vmem>>, vector<1x100xf32>
    %c0_32 = arith.constant 0 : index
    %c0_33 = arith.constant 0 : index
    %43 = vector.load %arg11[%c0_32, %c0_33] : memref<32x200xbf16, #tpu.memory_space<vmem>>, vector<32x200xbf16>
    %cst_34 = arith.constant dense<0.000000e+00> : vector<128x200xf32>
    %44 = tpu.matmul %1, %43, %cst_34 {dimension_numbers = #tpu.dot_dimension_numbers<[1], [0], [0], [1], [0, 0, 1, 1], [], []>} : vector<128x32xbf16>, vector<32x200xbf16>, vector<128x200xf32> -> vector<128x200xf32>
    %45 = vector.broadcast %40 : vector<1x200xf32> to vector<128x200xf32>
    %46 = arith.addf %44, %45 : vector<128x200xf32>
    %cst_35 = arith.constant 0.000000e+00 : f32
    %47 = vector.broadcast %cst_35 : f32 to vector<128x200xf32>
    %48 = arith.cmpf ogt, %46, %47 : vector<128x200xf32>
    %cst_36 = arith.constant 0.00999999977 : f32
    %49 = vector.broadcast %cst_36 : f32 to vector<128x200xf32>
    %50 = arith.mulf %49, %46 : vector<128x200xf32>
    %51 = arith.select %48, %46, %50 : vector<128x200xi1>, vector<128x200xf32>
    %52 = arith.truncf %51 : vector<128x200xf32> to vector<128x200xbf16>
    %c0_37 = arith.constant 0 : index
    %c0_38 = arith.constant 0 : index
    %53 = vector.load %arg13[%c0_37, %c0_38] : memref<200x200xbf16, #tpu.memory_space<vmem>>, vector<200x200xbf16>
    %cst_39 = arith.constant dense<0.000000e+00> : vector<128x200xf32>
    %54 = tpu.matmul %52, %53, %cst_39 {dimension_numbers = #tpu.dot_dimension_numbers<[1], [0], [0], [1], [0, 0, 1, 1], [], []>} : vector<128x200xbf16>, vector<200x200xbf16>, vector<128x200xf32> -> vector<128x200xf32>
    %55 = vector.broadcast %41 : vector<1x200xf32> to vector<128x200xf32>
    %56 = arith.addf %54, %55 : vector<128x200xf32>
    %cst_40 = arith.constant 0.000000e+00 : f32
    %57 = vector.broadcast %cst_40 : f32 to vector<128x200xf32>
    %58 = arith.cmpf ogt, %56, %57 : vector<128x200xf32>
    %cst_41 = arith.constant 0.00999999977 : f32
    %59 = vector.broadcast %cst_41 : f32 to vector<128x200xf32>
    %60 = arith.mulf %59, %56 : vector<128x200xf32>
    %61 = arith.select %58, %56, %60 : vector<128x200xi1>, vector<128x200xf32>
    %62 = arith.truncf %61 : vector<128x200xf32> to vector<128x200xbf16>
    %c0_42 = arith.constant 0 : index
    %c0_43 = arith.constant 0 : index
    %63 = vector.load %arg15[%c0_42, %c0_43] : memref<200x100xbf16, #tpu.memory_space<vmem>>, vector<200x100xbf16>
    %cst_44 = arith.constant dense<0.000000e+00> : vector<128x100xf32>
    %64 = tpu.matmul %62, %63, %cst_44 {dimension_numbers = #tpu.dot_dimension_numbers<[1], [0], [0], [1], [0, 0, 1, 1], [], []>} : vector<128x200xbf16>, vector<200x100xbf16>, vector<128x100xf32> -> vector<128x100xf32>
    %65 = vector.broadcast %42 : vector<1x100xf32> to vector<128x100xf32>
    %66 = arith.addf %64, %65 : vector<128x100xf32>
    %cst_45 = arith.constant 0.000000e+00 : f32
    %67 = vector.broadcast %cst_45 : f32 to vector<128x100xf32>
    %68 = arith.cmpf ogt, %66, %67 : vector<128x100xf32>
    %cst_46 = arith.constant 0.00999999977 : f32
    %69 = vector.broadcast %cst_46 : f32 to vector<128x100xf32>
    %70 = arith.mulf %69, %66 : vector<128x100xf32>
    %71 = arith.select %68, %66, %70 : vector<128x100xi1>, vector<128x100xf32>
    %c0_47 = arith.constant 0 : index
    %c0_48 = arith.constant 0 : index
    %72 = vector.load %arg17[%c0_47, %c0_48] : memref<1x100xbf16, #tpu.memory_space<vmem>>, vector<1x100xbf16>
    %73 = arith.truncf %71 : vector<128x100xf32> to vector<128x100xbf16>
    %cst_49 = arith.constant dense<0.000000e+00> : vector<1x128xf32>
    %74 = tpu.matmul %72, %73, %cst_49 {dimension_numbers = #tpu.dot_dimension_numbers<[1], [1], [0], [0], [0, 0, 1, 0], [], []>} : vector<1x100xbf16>, vector<128x100xbf16>, vector<1x128xf32> -> vector<1x128xf32>
    %c0_50 = arith.constant 0 : index
    %c0_51 = arith.constant 0 : index
    %75 = vector.load %arg18[%c0_50, %c0_51] : memref<1x1xf32, #tpu.memory_space<vmem>>, vector<1x1xf32>
    %76 = vector.broadcast %75 : vector<1x1xf32> to vector<1x128xf32>
    %77 = arith.addf %74, %76 : vector<1x128xf32>
    %c0_52 = arith.constant 0 : index
    %c0_53 = arith.constant 0 : index
    %78 = vector.load %arg2[%c0_52, %c0_53] : memref<1x128xf32, #tpu.memory_space<vmem>>, vector<1x128xf32>
    %cst_54 = arith.constant 0.000000e+00 : f32
    %79 = vector.broadcast %cst_54 : f32 to vector<1x128xf32>
    %80 = arith.cmpf ogt, %78, %79 : vector<1x128xf32>
    %81 = arith.select %80, %77, %39 : vector<1x128xi1>, vector<1x128xf32>
    %c0_55 = arith.constant 0 : index
    %c0_56 = arith.constant 0 : index
    %82 = vector.load %arg19[%c0_55, %c0_56] : memref<1x128xf32, #tpu.memory_space<vmem>>, vector<1x128xf32>
    tpu.vector_store %arg19[%c0_55, %c0_56], %81 {strides = array<i32>} : memref<1x128xf32, #tpu.memory_space<vmem>>, vector<1x128xf32>,
    return
  }
  func.func @transform_0(%arg0: i32) -> (i32, i32) {
    %c0_i32 = arith.constant 0 : i32
    %c0_i32_0 = arith.constant 0 : i32
    return %arg0, %c0_i32 : i32, i32
  }
  func.func @transform_1(%arg0: i32) -> (i32, i32) {
    %c0_i32 = arith.constant 0 : i32
    %c0_i32_0 = arith.constant 0 : i32
    return %c0_i32, %arg0 : i32, i32
  }
  func.func @transform_2(%arg0: i32) -> (i32, i32) {
    %c0_i32 = arith.constant 0 : i32
    %c0_i32_0 = arith.constant 0 : i32
    %c0_i32_1 = arith.constant 0 : i32
    return %c0_i32, %c0_i32_0 : i32, i32
  }
  func.func @transform_3(%arg0: i32) -> (i32, i32) {
    %c0_i32 = arith.constant 0 : i32
    %c0_i32_0 = arith.constant 0 : i32
    %c0_i32_1 = arith.constant 0 : i32
    return %c0_i32, %c0_i32_0 : i32, i32
  }
  func.func @transform_4(%arg0: i32) -> (i32, i32) {
    %c0_i32 = arith.constant 0 : i32
    %c0_i32_0 = arith.constant 0 : i32
    %c0_i32_1 = arith.constant 0 : i32
    return %c0_i32, %c0_i32_0 : i32, i32
  }
  func.func @transform_5(%arg0: i32) -> (i32, i32) {
    %c0_i32 = arith.constant 0 : i32
    %c0_i32_0 = arith.constant 0 : i32
    %c0_i32_1 = arith.constant 0 : i32
    return %c0_i32, %c0_i32_0 : i32, i32
  }
  func.func @transform_6(%arg0: i32) -> (i32, i32) {
    %c0_i32 = arith.constant 0 : i32
    %c0_i32_0 = arith.constant 0 : i32
    %c0_i32_1 = arith.constant 0 : i32
    return %c0_i32, %c0_i32_0 : i32, i32
  }
  func.func @transform_7(%arg0: i32) -> (i32, i32) {
    %c0_i32 = arith.constant 0 : i32
    %c0_i32_0 = arith.constant 0 : i32
    %c0_i32_1 = arith.constant 0 : i32
    return %c0_i32, %c0_i32_0 : i32, i32
  }
  func.func @transform_8(%arg0: i32) -> (i32, i32) {
    %c0_i32 = arith.constant 0 : i32
    %c0_i32_0 = arith.constant 0 : i32
    %c0_i32_1 = arith.constant 0 : i32
    return %c0_i32, %c0_i32_0 : i32, i32
  }
  func.func @transform_9(%arg0: i32) -> (i32, i32) {
    %c0_i32 = arith.constant 0 : i32
    %c0_i32_0 = arith.constant 0 : i32
    %c0_i32_1 = arith.constant 0 : i32
    return %c0_i32, %c0_i32_0 : i32, i32
  }
  func.func @transform_10(%arg0: i32) -> (i32, i32) {
    %c0_i32 = arith.constant 0 : i32
    %c0_i32_0 = arith.constant 0 : i32
    %c0_i32_1 = arith.constant 0 : i32
    return %c0_i32, %c0_i32_0 : i32, i32
  }
  func.func @transform_11(%arg0: i32) -> (i32, i32) {
    %c0_i32 = arith.constant 0 : i32
    %c0_i32_0 = arith.constant 0 : i32
    %c0_i32_1 = arith.constant 0 : i32
    return %c0_i32, %c0_i32_0 : i32, i32
  }
  func.func @transform_12(%arg0: i32) -> (i32, i32) {
    %c0_i32 = arith.constant 0 : i32
    %c0_i32_0 = arith.constant 0 : i32
    %c0_i32_1 = arith.constant 0 : i32
    return %c0_i32, %c0_i32_0 : i32, i32
  }
  func.func @transform_13(%arg0: i32) -> (i32, i32) {
    %c0_i32 = arith.constant 0 : i32
    %c0_i32_0 = arith.constant 0 : i32
    %c0_i32_1 = arith.constant 0 : i32
    return %c0_i32, %c0_i32_0 : i32, i32
  }
  func.func @transform_14(%arg0: i32) -> (i32, i32) {
    %c0_i32 = arith.constant 0 : i32
    %c0_i32_0 = arith.constant 0 : i32
    %c0_i32_1 = arith.constant 0 : i32
    return %c0_i32, %c0_i32_0 : i32, i32
  }
  func.func @transform_15(%arg0: i32) -> (i32, i32) {
    %c0_i32 = arith.constant 0 : i32
    %c0_i32_0 = arith.constant 0 : i32
    %c0_i32_1 = arith.constant 0 : i32
    return %c0_i32, %c0_i32_0 : i32, i32
  }
  func.func @transform_16(%arg0: i32) -> (i32, i32) {
    %c0_i32 = arith.constant 0 : i32
    %c0_i32_0 = arith.constant 0 : i32
    %c0_i32_1 = arith.constant 0 : i32
    return %c0_i32, %c0_i32_0 : i32, i32
  }
  func.func @transform_17(%arg0: i32) -> (i32, i32) {
    %c0_i32 = arith.constant 0 : i32
    %c0_i32_0 = arith.constant 0 : i32
    %c0_i32_1 = arith.constant 0 : i32
    return %c0_i32, %c0_i32_0 : i32, i32
  }
  func.func @transform_18(%arg0: i32) -> (i32, i32) {
    %c0_i32 = arith.constant 0 : i32
    %c0_i32_0 = arith.constant 0 : i32
    return %c0_i32, %arg0 : i32, i32
  }
}

</mosaic_0001>

<bundles_post_ra>
// kernel: tpu_custom_call.1
= control target key start
LH: loop header
LB: loop body
LE: loop exit
PB: predicated region body
PF: predicated region fallthrough
CT: control target
= control target key end

     0   :  { %s3532_s0 = inlined_call_operand.hbm [shape: f32[8,32], index: 0, kind: input, shape index: {}]   ;;  %s3533_s1 = inlined_call_operand.vmem [shape: f32[1,8], index: 1, kind: input, shape index: {}]   ;;  %s3534_s2 = inlined_call_operand.hbm [shape: bf16[32,200], index: 2, kind: input, shape index: {}]   ;;  %s3535_s3 = inlined_call_operand.vmem [shape: f32[1,200], index: 3, kind: input, shape index: {}]   ;;  %s3536_s4 = inlined_call_operand.hbm [shape: bf16[200,200], index: 4, kind: input, shape index: {}]   ;;  %s3537_s5 = inlined_call_operand.vmem [shape: f32[1,200], index: 5, kind: input, shape index: {}]   ;;  %s3538_s6 = inlined_call_operand.hbm [shape: bf16[200,100], index: 6, kind: input, shape index: {}]   ;;  %s3539_s7 = inlined_call_operand.hbm [shape: f32[1,100], index: 7, kind: input, shape index: {}]   ;;  %s3540_s8 = inlined_call_operand.hbm [shape: bf16[1,100], index: 8, kind: input, shape index: {}]   ;;  %s3541_s9 = inlined_call_operand.<no memory space> [shape: f32[1,1], index: 9, kind: input, shape index: {}]   ;;  %s3542_s10 = inlined_call_operand.vmem [shape: bf16[32,200], index: 10, kind: input, shape index: {}]   ;;  %s3543_s11 = inlined_call_operand.vmem [shape: f32[1,200], index: 11, kind: input, shape index: {}]   ;;  %s3544_s12 = inlined_call_operand.hbm [shape: bf16[200,200], index: 12, kind: input, shape index: {}]   ;;  %s3545_s13 = inlined_call_operand.vmem [shape: f32[1,200], index: 13, kind: input, shape index: {}]   ;;  %s3546_s14 = inlined_call_operand.hbm [shape: bf16[200,100], index: 14, kind: input, shape index: {}]   ;;  %s3547_s15 = inlined_call_operand.vmem [shape: f32[1,100], index: 15, kind: input, shape index: {}]   ;;  %s3548_s16 = inlined_call_operand.vmem [shape: bf16[1,100], index: 16, kind: input, shape index: {}]   ;;  %s3549_s18 = inlined_call_operand.hbm [shape: f32[1,8], index: 18, kind: output, shape index: {}]   ;;  %s3550_s17 = inlined_call_operand.<no memory space> [shape: f32[1,1], index: 17, kind: input, shape index: {}]  }
   0x1   :  { %3555 = sst [smem:[#allocation25_spill]] %s3532_s0  ;;  %v23_v0 = vstv %s3541_s9  ;;  %v25_v1 = vstv %s3550_s17 }
   0x2   :  { %3556 = sst [smem:[#allocation26_spill]] %s3533_s1  ;;  %24 = vst [vmem:[#allocation2] sm:$0x1] %v23_v0  ;;  %26 = vst [vmem:[#allocation3] sm:$0x1] %v25_v1 }
   0x3   :  { %3557 = sst [smem:[#allocation27_spill]] %s3534_s2 }
   0x4   :  { %27 = vsyncpa [#allocation5], 0 }
   0x5   :  { %28 = vsyncpa [#allocation8], 0 }
   0x6   :  { %29 = vsyncpa [#allocation11], 0 }
   0x7   :  { %30 = vsyncpa [#allocation14], 0 }
   0x8   :  { %31 = vsyncpa [#allocation17], 0 }
   0x9   :  { %32 = vsyncpa [#allocation6], 0 }
   0xa   :  { %37 = vsyncadd [#allocation5], 1920  ;;  %s2870_s0 = smov [#allocation7]   ;;  %s2871_s1 = smov [#allocation10]  }
   0xb   :  { %s52_s19 = sshll.u32 %s2870_s0, 4  ;;  %s80_s20 = sshll.u32 %s2871_s1, 4  ;;  %s53_s19 = int_to_ptr.vmem [resolvable:$true] %s52_s19  ;;  %s2987_s20 = int_to_ptr.vmem [resolvable:$true] %s80_s20 }
   0xc   :  { %s3558_s22 = sld [smem:[#allocation27_spill]] }
  0x12   :  { %s2660_s17 = scalar_lea.hbm %s3558_s22, 512 }
  0x13   :  { %p2661_p0 = scmp.ne.s32.totalorder %s3558_s22, %s2660_s17  ;;  %p2664_p1 = scmp.lt.u32.totalorder %s2660_s17, %s3558_s22 }
  0x15   :  { %p2666_p2 = pnand %p2664_p1, %p2661_p0 }
  0x17   :  { %2669 = shalt.err (!%p2666_p2)
}
  0x18   :  { %s2670_s26 = scalar_lea.vmem %s53_s19, 512  ;;  %p2675_p4 = scmp.lt.s32.totalorder %s53_s19, %s53_s19 }
  0x19   :  { %p2671_p3 = scmp.ne.s32.totalorder %s53_s19, %s2670_s26  ;;  %p2676_p5 = scmp.lt.s32.totalorder %s2670_s26, %s2670_s26 }
  0x1b   :  { %p2677_p6 = por %p2676_p5, %p2675_p4 }
  0x1d   :  { %p2678_p7 = pnand %p2677_p6, %p2671_p3 }
  0x1f   :  { %2681 = shalt.err (!%p2678_p7)
}
  0x20   :  { %s3553_s27 = smov 128   ;;  %s2873_s28 = smov 8  }
  0x21   :  { %58 = dma.hbm_to_vmem [thread:$0]  %s3558_s22, 512, %s53_s19, [#allocation8], %s3553_s27, %s3553_s27, %s2873_s28  }
  0x22   :  { %s2682_s9 = scalar_lea.hbm %s3538_s6, 1600 }
  0x23   :  { %p2683_p8 = scmp.ne.s32.totalorder %s3538_s6, %s2682_s9  ;;  %p2686_p9 = scmp.lt.u32.totalorder %s2682_s9, %s3538_s6 }
  0x25   :  { %p2688_p10 = pnand %p2686_p9, %p2683_p8 }
  0x27   :  { %2691 = shalt.err (!%p2688_p10)
}
  0x28   :  { %s2692_s24 = scalar_lea.vmem %s2987_s20, 1600  ;;  %p2697_p12 = scmp.lt.s32.totalorder %s2987_s20, %s2987_s20 }
  0x29   :  { %p2693_p11 = scmp.ne.s32.totalorder %s2987_s20, %s2692_s24  ;;  %p2698_p13 = scmp.lt.s32.totalorder %s2692_s24, %s2692_s24 }
  0x2b   :  { %p2699_p0 = por %p2698_p13, %p2697_p12 }
  0x2d   :  { %p2700_p1 = pnand %p2699_p0, %p2693_p11 }
  0x2f   :  { %2703 = shalt.err (!%p2700_p1)
}
  0x30   :  { %s2874_s19 = smov 64   ;;  %s2875_s22 = smov 4  }
  0x31   :  { %86 = dma.hbm_to_vmem [thread:$0]  %s3538_s6, 1600, %s2987_s20, [#allocation11], %s2874_s19, %s2874_s19, %s2875_s22  }
  0x32   :  { %s2876_s29 = smov [#allocation13]   ;;  %s2877_s0 = smov [#allocation4]  }
  0x33   :  { %s103_s30 = sshll.u32 %s2876_s29, 4  ;;  %s38_s1 = sshll.u32 %s2877_s0, 4  ;;  %s104_s30 = int_to_ptr.vmem [resolvable:$true] %s103_s30  ;;  %s3024_s1 = int_to_ptr.vmem [resolvable:$true] %s38_s1 }
  0x34   :  { %s2704_s17 = scalar_lea.hbm %s3540_s8, 16 }
  0x35   :  { %p2705_p2 = scmp.ne.s32.totalorder %s3540_s8, %s2704_s17  ;;  %p2708_p3 = scmp.lt.u32.totalorder %s2704_s17, %s3540_s8 }
  0x37   :  { %p2710_p4 = pnand %p2708_p3, %p2705_p2 }
  0x39   :  { %2713 = shalt.err (!%p2710_p4)
}
  0x3a   :  { %s2714_s6 = scalar_lea.vmem %s104_s30, 16  ;;  %s2718_s20 = scalar_lea.vmem %s104_s30, 32 }
  0x3b   :  { %p2715_p5 = scmp.ne.s32.totalorder %s104_s30, %s2714_s6  ;;  %p2719_p6 = scmp.lt.s32.totalorder %s104_s30, %s104_s30 }
  0x3c   :  { %p2720_p7 = scmp.lt.s32.totalorder %s2718_s20, %s2714_s6 }
  0x3e   :  { %p2721_p8 = por %p2720_p7, %p2719_p6 }
  0x40   :  { %p2722_p9 = pnand %p2721_p8, %p2715_p5 }
  0x42   :  { %2725 = shalt.err (!%p2722_p9)
}
  0x43   :  { %106 = dma.hbm_to_vmem [thread:$0]  %s3540_s8, 16, %s104_s30, [#allocation14]  }
  0x44   :  { %s3559_s9 = sld [smem:[#allocation25_spill]] }
  0x4a   :  { %s2726_s21 = scalar_lea.hbm %s3559_s9, 128 }
  0x4b   :  { %p2727_p10 = scmp.ne.s32.totalorder %s3559_s9, %s2726_s21  ;;  %p2730_p11 = scmp.lt.u32.totalorder %s2726_s21, %s3559_s9 }
  0x4d   :  { %p2732_p12 = pnand %p2730_p11, %p2727_p10 }
  0x4f   :  { %2735 = shalt.err (!%p2732_p12)
}
  0x50   :  { %s2736_s24 = scalar_lea.vmem %s3024_s1, 128  ;;  %s2740_s8 = scalar_lea.vmem %s3024_s1, 2048 }
  0x51   :  { %p2737_p13 = scmp.ne.s32.totalorder %s3024_s1, %s2736_s24  ;;  %p2741_p0 = scmp.lt.s32.totalorder %s3024_s1, %s3024_s1 }
  0x52   :  { %p2742_p1 = scmp.lt.s32.totalorder %s2740_s8, %s2736_s24 }
  0x54   :  { %p2743_p2 = por %p2742_p1, %p2741_p0 }
  0x56   :  { %p2744_p3 = pnand %p2743_p2, %p2737_p13 }
  0x58   :  { %2747 = shalt.err (!%p2744_p3)
}
  0x59   :  { %s3560_s30 = smov 128   ;;  %s2878_s25 = smov [#allocation9]  }
  0x5a   :  { %44 = dma.hbm_to_vmem [thread:$0]  %s3559_s9, 128, %s3024_s1, [#allocation5], %s3560_s30, %s3560_s30, %s2873_s28  }
  0x5b   :  { %s66_s26 = sshll.u32 %s2878_s25, 4  ;;  %s2879_s29 = smov [#allocation12]   ;;  %s67_s26 = int_to_ptr.vmem [resolvable:$true] %s66_s26 }
  0x5c   :  { %s93_s0 = sshll.u32 %s2879_s29, 4  ;;  %s2748_s17 = scalar_lea.hbm %s3536_s4, 3200  ;;  %s94_s0 = int_to_ptr.vmem [resolvable:$true] %s93_s0 }
  0x5d   :  { %p2749_p4 = scmp.ne.s32.totalorder %s3536_s4, %s2748_s17  ;;  %p2752_p5 = scmp.lt.u32.totalorder %s2748_s17, %s3536_s4 }
  0x5f   :  { %p2754_p6 = pnand %p2752_p5, %p2749_p4 }
  0x61   :  { %2757 = shalt.err (!%p2754_p6)
}
  0x62   :  { %s2758_s1 = scalar_lea.vmem %s67_s26, 3200  ;;  %p2763_p8 = scmp.lt.s32.totalorder %s67_s26, %s67_s26 }
  0x63   :  { %p2759_p7 = scmp.ne.s32.totalorder %s67_s26, %s2758_s1  ;;  %p2764_p9 = scmp.lt.s32.totalorder %s2758_s1, %s2758_s1 }
  0x65   :  { %p2765_p10 = por %p2764_p9, %p2763_p8 }
  0x67   :  { %p2766_p11 = pnand %p2765_p10, %p2759_p7 }
  0x69   :  { %2769 = shalt.err (!%p2766_p11)
}
  0x6a   :  { %72 = dma.hbm_to_vmem [thread:$0]  %s3536_s4, 3200, %s67_s26, [#allocation8], %s3560_s30, %s3560_s30, %s2873_s28  }
  0x6b   :  { %s2770_s29 = scalar_lea.hbm %s3539_s7, 16 }
  0x6c   :  { %p2771_p12 = scmp.ne.s32.totalorder %s3539_s7, %s2770_s29  ;;  %p2774_p13 = scmp.lt.u32.totalorder %s2770_s29, %s3539_s7 }
  0x6e   :  { %p2776_p0 = pnand %p2774_p13, %p2771_p12 }
  0x70   :  { %2779 = shalt.err (!%p2776_p0)
}
  0x71   :  { %s2780_s23 = scalar_lea.vmem %s94_s0, 16  ;;  %s2784_s24 = scalar_lea.vmem %s94_s0, 32 }
  0x72   :  { %p2781_p1 = scmp.ne.s32.totalorder %s94_s0, %s2780_s23  ;;  %p2785_p2 = scmp.lt.s32.totalorder %s94_s0, %s94_s0 }
  0x73   :  { %p2786_p3 = scmp.lt.s32.totalorder %s2784_s24, %s2780_s23 }
  0x75   :  { %p2787_p4 = por %p2786_p3, %p2785_p2 }
  0x77   :  { %p2788_p5 = pnand %p2787_p4, %p2781_p1 }
  0x79   :  { %2791 = shalt.err (!%p2788_p5)
}
  0x7a   :  { %96 = dma.hbm_to_vmem [thread:$0]  %s3539_s7, 16, %s94_s0, [#allocation11]  }
  0x7b   :  { %s2880_s8 = smov [#allocation15]   ;;  %s2881_s9 = smov [#allocation16]  }
  0x7c   :  { %s118_s1 = sshll.u32 %s2880_s8, 4  ;;  %s132_s6 = sshll.u32 %s2881_s9, 4  ;;  %s119_s1 = int_to_ptr.vmem [resolvable:$true] %s118_s1  ;;  %s3086_s6 = int_to_ptr.vmem [resolvable:$true] %s132_s6 }
  0x7d   :  { %s2792_s29 = scalar_lea.hbm %s3544_s12, 3200 }
  0x7e   :  { %p2793_p6 = scmp.ne.s32.totalorder %s3544_s12, %s2792_s29  ;;  %p2796_p7 = scmp.lt.u32.totalorder %s2792_s29, %s3544_s12 }
  0x80   :  { %p2798_p8 = pnand %p2796_p7, %p2793_p6 }
  0x82   :  { %2801 = shalt.err (!%p2798_p8)
}
  0x83   :  { %s2802_s7 = scalar_lea.vmem %s119_s1, 3200  ;;  %p2807_p10 = scmp.lt.s32.totalorder %s119_s1, %s119_s1 }
  0x84   :  { %p2803_p9 = scmp.ne.s32.totalorder %s119_s1, %s2802_s7  ;;  %p2808_p11 = scmp.lt.s32.totalorder %s2802_s7, %s2802_s7 }
  0x86   :  { %p2809_p12 = por %p2808_p11, %p2807_p10 }
  0x88   :  { %p2810_p13 = pnand %p2809_p12, %p2803_p9 }
  0x8a   :  { %2813 = shalt.err (!%p2810_p13)
}
  0x8b   :  { %124 = dma.hbm_to_vmem [thread:$0]  %s3544_s12, 3200, %s119_s1, [#allocation14], %s3560_s30, %s3560_s30, %s2873_s28  }
  0x8c   :  { %s2814_s26 = scalar_lea.hbm %s3546_s14, 1600 }
  0x8d   :  { %p2815_p0 = scmp.ne.s32.totalorder %s3546_s14, %s2814_s26  ;;  %p2818_p1 = scmp.lt.u32.totalorder %s2814_s26, %s3546_s14 }
  0x8f   :  { %p2820_p2 = pnand %p2818_p1, %p2815_p0 }
  0x91   :  { %2823 = shalt.err (!%p2820_p2)
}
  0x92   :  { %s2824_s29 = scalar_lea.vmem %s3086_s6, 1600  ;;  %p2829_p4 = scmp.lt.s32.totalorder %s3086_s6, %s3086_s6 }
  0x93   :  { %p2825_p3 = scmp.ne.s32.totalorder %s3086_s6, %s2824_s29  ;;  %p2830_p5 = scmp.lt.s32.totalorder %s2824_s29, %s2824_s29 }
  0x95   :  { %p2831_p6 = por %p2830_p5, %p2829_p4 }
  0x97   :  { %p2832_p7 = pnand %p2831_p6, %p2825_p3 }
  0x99   :  { %2835 = shalt.err (!%p2832_p7)
}
  0x9a   :  { %138 = dma.hbm_to_vmem [thread:$0]  %s3546_s14, 1600, %s3086_s6, [#allocation17], %s2874_s19, %s2874_s19, %s2875_s22  }
  0x9b   :  { %2858 = dma.done.wait [#allocation5], 2048  }
  0x9c   :  { %2859 = vsyncadd [#allocation5], 4294965248 }
  0x9d   :  { %2860 = dma.done.wait [#allocation8], 3712  }
  0x9e   :  { %2861 = vsyncadd [#allocation8], 4294963584 }
  0x9f   :  { %2862 = dma.done.wait [#allocation11], 1616  }
  0xa0   :  { %2863 = vsyncadd [#allocation11], 4294965680 }
  0xa1   :  { %2864 = dma.done.wait [#allocation14], 3216  }
  0xa2   :  { %2865 = vsyncadd [#allocation14], 4294964080 }
  0xa3   :  { %2866 = dma.done.wait [#allocation17], 1600  }
  0xa4   :  { %2867 = vsyncadd [#allocation17], 4294965696  ;;  %v2882_v2 = vmov 0   ;;  %v2546_v3 = vld [vmem:[#allocation7 + $0x4] ss:$8 sps:$4 sm:$0xff]   ;;  %vm232_vm0 = vcmask 261120  }
  0xa5   :  { %289 = vmatprep.mubr.bf16.mxu0 %v2882_v2  ;;  %2545 = vset.pattern.permute.xlu0 %v2882_v2  ;;  %v2548_v4 = vld [vmem:[#allocation7] ss:$8 sps:$4 sm:$0xff]   ;;  %v2549_v5 = vld [vmem:[#allocation7 + $0x14] ss:$8 sps:$4 sm:$0xff]   ;;  %v2551_v6 = vld [vmem:[#allocation7 + $0x10] ss:$8 sps:$4 sm:$0xff]  }
  0xa6   :  { %257 = vmatprep.subr.bf16.mxu0 %v2546_v3  ;;  %v170_v7 = vld [vmem:[#allocation4] sm:$0xff]  ;;  %v171_v8 = vld [vmem:[#allocation4 + $0x8] sm:$0xff]  ;;  %v172_v12 = vld [vmem:[#allocation4 + $0x10] sm:$0xff]  ;;  %vm668_vm1 = vcmask 1043456   ;;  %vm643_vm6 = vcmask 588800   ;;  %s3561_s8 = sld [smem:[#allocation26_spill]] }
  0xa7   :  { %258 = vmatpush1.bf16.msra.mxu0 %v2548_v4  ;;  %v3125_v9 = vpack.c.bf16 %v171_v8, %v170_v7  ;;  %v2552_v10 = vld [vmem:[#allocation9 + $0x4] ss:$8 sps:$4 sm:$0xff]   ;;  %v2554_v11 = vld [vmem:[#allocation9] ss:$8 sps:$4 sm:$0xff]   ;;  %v2555_v13 = vld [vmem:[#allocation9 + $0x14] ss:$8 sps:$4 sm:$0xff]   ;;  %v202_v7 = vlaneseq }
  0xa8   :  { %259 = vmatprep.subr.bf16.mxu0 %v2549_v5  ;;  %675 = vmatprep.subr.bf16.mxu1 %v2552_v10  ;;  %v173_v14 = vld [vmem:[#allocation4 + $0x18] sm:$0xff]  ;;  %v2558_v16 = vld [vmem:[#allocation9 + $0x24] ss:$8 sps:$4 sm:$0xff]   ;;  %v2560_v18 = vld [vmem:[#allocation9 + $0x20] ss:$8 sps:$4 sm:$0xff]   ;;  %s2885_s9 = smov [#allocation18]  }
  0xa9   :  { %676 = vmatpush1.bf16.msra.mxu1 %v2554_v11  ;;  %v2557_v15 = vld [vmem:[#allocation9 + $0x10] ss:$8 sps:$4 sm:$0xff]   ;;  %v3131_v17 = vpack.c.bf16 %v173_v14, %v172_v12  ;;  %v2561_v19 = vld [vmem:[#allocation9 + $0x34] ss:$8 sps:$4 sm:$0xff]   ;;  %v174_v20 = vld [vmem:[#allocation4 + $0x20] sm:$0xff]  ;;  %v203_v8 = vshrl.u32 %v202_v7, 7 }
  0xaa   :  { %677 = vmatprep.subr.bf16.mxu1 %v2555_v13  ;;  %v175_v21 = vld [vmem:[#allocation4 + $0x28] sm:$0xff]  ;;  %v2563_v22 = vld [vmem:[#allocation9 + $0x30] ss:$8 sps:$4 sm:$0xff]   ;;  %v2567_v26 = vld [vmem:[#allocation9 + $0x54] ss:$8 sps:$4 sm:$0xff]   ;;  %s2318_s20 = sshll.u32 %s2885_s9, 4  ;;  %s2319_s20 = int_to_ptr.vmem [resolvable:$true] %s2318_s20 }
  0xab   :  { %260 = vmatpush1.bf16.msra.mxu0 %v2551_v6  ;;  %v2564_v23 = vld [vmem:[#allocation9 + $0x44] ss:$8 sps:$4 sm:$0xff]   ;;  %v2566_v24 = vld [vmem:[#allocation9 + $0x40] ss:$8 sps:$4 sm:$0xff]   ;;  %v3136_v25 = vpack.c.bf16 %v175_v21, %v174_v20  ;;  %v176_v27 = vld [vmem:[#allocation4 + $0x30] sm:$0xff]  ;;  %v3178_v10 = vsub.s32 0, %v203_v8  ;;  %p2841_p9 = scmp.lt.s32.totalorder %s2319_s20, %s2319_s20 }
  0xac   :  { %1033 = vmatprep.subr.bf16.mxu0 %v2882_v2  ;;  %v177_v28 = vld [vmem:[#allocation4 + $0x38] sm:$0xff]  ;;  %v2570_v30 = vld [vmem:[#allocation9 + $0x64] ss:$8 sps:$4 sm:$0xff]   ;;  %v2572_v31 = vld [vmem:[#allocation9 + $0x60] ss:$8 sps:$4 sm:$0xff]   ;;  %v3183_v12 = vsub.s32 1, %v203_v8 }
  0xad   :  { %678 = vmatpush1.bf16.msra.mxu1 %v2557_v15  ;;  %v2569_v29 = vld [vmem:[#allocation9 + $0x50] ss:$8 sps:$4 sm:$0xff]   ;;  %v3141_v32 = vpack.c.bf16 %v177_v28, %v176_v27  ;;  %v2573_v33 = vld [vmem:[#allocation9 + $0x74] ss:$8 sps:$4 sm:$0xff]   ;;  %v178_v34 = vld [vmem:[#allocation4 + $0x40] sm:$0xff]  ;;  %s2840_s25 = scalar_lea.vmem %s2319_s20, 32 }
  0xae   :  { %2335 = vmatmul.mubr.msk.bf16.vlgmr.msra.gmra.mrb[0].mxu0 %vm232_vm0, %v3125_v9  ;;  %679 = vmatprep.subr.bf16.mxu1 %v2558_v16  ;;  %v179_v35 = vld [vmem:[#allocation4 + $0x48] sm:$0xff]  ;;  %v2575_v36 = vld [vmem:[#allocation9 + $0x70] ss:$8 sps:$4 sm:$0xff]   ;;  %v2579_v40 = vld [vmem:[#allocation9 + $0x94] ss:$8 sps:$4 sm:$0xff]  }
  0xaf   :  { %299 = vmatprep.mubr.bf16.mxu0 %v2882_v2  ;;  %v2576_v37 = vld [vmem:[#allocation9 + $0x84] ss:$8 sps:$4 sm:$0xff]   ;;  %v2578_v38 = vld [vmem:[#allocation9 + $0x80] ss:$8 sps:$4 sm:$0xff]   ;;  %v3146_v39 = vpack.c.bf16 %v179_v35, %v178_v34  ;;  %v180_v41 = vld [vmem:[#allocation4 + $0x50] sm:$0xff] }
  0xb0   :  { %v181_v42 = vld [vmem:[#allocation4 + $0x58] sm:$0xff]  ;;  %v182_v45 = vld [vmem:[#allocation4 + $0x60] sm:$0xff]  ;;  %v183_v46 = vld [vmem:[#allocation4 + $0x68] sm:$0xff] }
  0xb1   :  { %680 = vmatpush1.bf16.msra.mxu1 %v2560_v18  ;;  %v2581_v43 = vld [vmem:[#allocation9 + $0x90] ss:$8 sps:$4 sm:$0xff]   ;;  %v3151_v44 = vpack.c.bf16 %v181_v42, %v180_v41  ;;  %v3156_v47 = vpack.c.bf16 %v183_v46, %v182_v45  ;;  %v2582_v51 = vld [vmem:[#allocation9 + $0xa4] ss:$8 sps:$4 sm:$0xff]   ;;  %v2584_v52 = vld [vmem:[#allocation9 + $0xa0] ss:$8 sps:$4 sm:$0xff]  }
  0xb2   :  { %681 = vmatprep.subr.bf16.mxu1 %v2561_v19  ;;  %v184_v48 = vld [vmem:[#allocation4 + $0x70] sm:$0xff]  ;;  %v185_v49 = vld [vmem:[#allocation4 + $0x78] sm:$0xff]  ;;  %v506_v55 = vld [vmem:[#allocation9 + $0xc0] sm:$0xff] }
  0xb3   :  { %v3161_v50 = vpack.c.bf16 %v185_v49, %v184_v48  ;;  %v2585_v53 = vld [vmem:[#allocation9 + $0xb4] ss:$8 sps:$4 sm:$0xff]   ;;  %v2587_v54 = vld [vmem:[#allocation9 + $0xb0] ss:$8 sps:$4 sm:$0xff]   ;;  %v2368_v56 = vcombine.high %v506_v55, %v506_v55  ;;  %v2367_v57 = vcombine.low %v506_v55, %v506_v55  ;;  %v2590_v59 = vld [vmem:[#allocation10] sm:$0xff]  }
  0xb4   :  { %1034 = vmatpush1.bf16.msra.mxu0 %v2590_v59  ;;  %v2591_v60 = vld [vmem:[#allocation10 + $0x8] sm:$0xff]   ;;  %v2592_v61 = vld [vmem:[#allocation10 + $0x10] sm:$0xff]   ;;  %v2593_v62 = vld [vmem:[#allocation10 + $0x18] sm:$0xff]  }
  0xb5   :  { %682 = vmatpush1.bf16.msra.mxu1 %v2563_v22  ;;  %v670_v58 = vsel %vm668_vm1, %v2367_v57, 0  ;;  %1035 = vmatprep.subr.bf16.mxu0 %v2882_v2  ;;  %v2594_v63 = vld [vmem:[#allocation10 + $0x20] sm:$0xff]   ;;  %v2595_v0 = vld [vmem:[#allocation10 + $0x28] sm:$0xff]   ;;  %v2596_v1 = vld [vmem:[#allocation10 + $0x30] sm:$0xff]  }
  0xb6   :  { %2336 = vmatmul.mubr.msk.bf16.gmra.mrb[4].mxu0 %vm232_vm0, %v3131_v17  ;;  %683 = vmatprep.subr.bf16.mxu1 %v2564_v23  ;;  %v2597_v3 = vld [vmem:[#allocation10 + $0x38] sm:$0xff]   ;;  %v2598_v4 = vld [vmem:[#allocation10 + $0x40] sm:$0xff]   ;;  %v2599_v5 = vld [vmem:[#allocation10 + $0x48] sm:$0xff]  }
  0xb7   :  { %309 = vmatprep.mubr.bf16.mxu0 %v2882_v2  ;;  %v2600_v6 = vld [vmem:[#allocation10 + $0x50] sm:$0xff]  }
  0xb8   :  { %1036 = vmatpush1.bf16.msra.mxu0 %v2591_v60  ;;  %v194_v11 = vld [vmem:[%s3535_s3] sm:$0x3] }
  0xb9   :  { %684 = vmatpush1.bf16.msra.mxu1 %v2566_v24  ;;  %1037 = vmatprep.subr.bf16.mxu0 %v2882_v2  ;;  %v3186_v13 = vrot.slane %v194_v11, %v3178_v10  ;;  %v3189_v14 = vrot.slane %v194_v11, %v3183_v12 }
  0xba   :  { %685 = vmatprep.subr.bf16.mxu1 %v2567_v26 }
  0xbc   :  { %1038 = vmatpush1.bf16.msra.mxu0 %v2592_v61 }
  0xbd   :  { %686 = vmatpush1.bf16.msra.mxu1 %v2569_v29  ;;  %1039 = vmatprep.subr.bf16.mxu0 %v2882_v2 }
  0xbe   :  { %2337 = vmatmul.mubr.msk.bf16.gmra.mrb[8].mxu0 %vm232_vm0, %v3136_v25  ;;  %687 = vmatprep.subr.bf16.mxu1 %v2570_v30 }
  0xbf   :  { %319 = vmatprep.mubr.bf16.mxu0 %v2882_v2 }
  0xc0   :  { %1040 = vmatpush1.bf16.msra.mxu0 %v2593_v62 }
  0xc1   :  { %688 = vmatpush1.bf16.msra.mxu1 %v2572_v31  ;;  %1041 = vmatprep.subr.bf16.mxu0 %v2882_v2 }
  0xc2   :  { %689 = vmatprep.subr.bf16.mxu1 %v2573_v33 }
  0xc4   :  { %1042 = vmatpush1.bf16.msra.mxu0 %v2594_v63 }
  0xc5   :  { %690 = vmatpush1.bf16.msra.mxu1 %v2575_v36  ;;  %1043 = vmatprep.subr.bf16.mxu0 %v2882_v2 }
  0xc6   :  { %2338 = vmatmul.mubr.msk.bf16.gmra.mrb[12].mxu0 %vm232_vm0, %v3141_v32  ;;  %691 = vmatprep.subr.bf16.mxu1 %v2576_v37 }
  0xc7   :  { %329 = vmatprep.mubr.bf16.mxu0 %v2882_v2 }
  0xc8   :  { %1044 = vmatpush1.bf16.msra.mxu0 %v2595_v0 }
  0xc9   :  { %692 = vmatpush1.bf16.msra.mxu1 %v2578_v38  ;;  %1045 = vmatprep.subr.bf16.mxu0 %v2882_v2 }
  0xca   :  { %693 = vmatprep.subr.bf16.mxu1 %v2579_v40 }
  0xcc   :  { %1046 = vmatpush1.bf16.msra.mxu0 %v2596_v1 }
  0xcd   :  { %694 = vmatpush1.bf16.msra.mxu1 %v2581_v43  ;;  %1047 = vmatprep.subr.bf16.mxu0 %v2882_v2 }
  0xce   :  { %2339 = vmatmul.mubr.msk.bf16.gmra.mrb[16].mxu0 %vm232_vm0, %v3146_v39  ;;  %695 = vmatprep.subr.bf16.mxu1 %v2582_v51 }
  0xcf   :  { %339 = vmatprep.mubr.bf16.mxu0 %v2882_v2 }
  0xd0   :  { %1048 = vmatpush1.bf16.msra.mxu0 %v2597_v3 }
  0xd1   :  { %696 = vmatpush1.bf16.msra.mxu1 %v2584_v52  ;;  %1049 = vmatprep.subr.bf16.mxu0 %v2882_v2 }
  0xd2   :  { %697 = vmatprep.subr.bf16.mxu1 %v2585_v53 }
  0xd4   :  { %1050 = vmatpush1.bf16.msra.mxu0 %v2598_v4 }
  0xd5   :  { %698 = vmatpush1.bf16.msra.mxu1 %v2587_v54  ;;  %1051 = vmatprep.subr.bf16.mxu0 %v2882_v2 }
  0xd6   :  { %2340 = vmatmul.mubr.msk.bf16.gmra.mrb[20].mxu0 %vm232_vm0, %v3151_v44  ;;  %2369 = vmatprep.subr.msk.bf16.mxu1 %vm668_vm1, %v2368_v56 }
  0xd7   :  { %349 = vmatprep.mubr.bf16.mxu0 %v2882_v2 }
  0xd8   :  { %1052 = vmatpush1.bf16.msra.mxu0 %v2599_v5 }
  0xd9   :  { %700 = vmatpush1.bf16.msra.mxu1 %v670_v58  ;;  %1053 = vmatprep.subr.bf16.mxu0 %v2882_v2 }
  0xdc   :  { %1054 = vmatpush1.bf16.msra.mxu0 %v2600_v6 }
  0xdd   :  { %1055 = vmatprep.subr.bf16.mxu0 %v2882_v2 }
  0xde   :  { %2341 = vmatmul.mubr.msk.bf16.gmra.mrb[24].mxu0 %vm232_vm0, %v3156_v47 }
  0xdf   :  { %359 = vmatprep.mubr.bf16.mxu0 %v2882_v2 }
  0xe6   :  { %2342 = vmatmul.mubr.msk.bf16.gmra.mrb[28].mxu0 %vm232_vm0, %v3161_v50 }
 0x181   :  { %v291_v15 = vpop.f32.mrb[0].mxu0 }
 0x182   :  { %v292_v16 = vadd.f32 %v291_v15, %v3186_v13  ;;  %v293_v18 = vpop.f32.mrb[1].mxu0 }
 0x183   :  { %v294_v19 = vadd.f32 %v293_v18, %v3189_v14  ;;  %v295_v20 = vpop.f32.mrb[2].mxu0 }
 0x184   :  { %v402_v21 = vmul.f32 0.01, %v292_v16  ;;  %v296_v22 = vadd.f32 %v295_v20, %v3186_v13  ;;  %v297_v23 = vpop.f32.mrb[3].mxu0  ;;  %vm370_vm2 = vcmp.gt.f32.partialorder %v292_v16, 0.0 }
 0x185   :  { %v403_v24 = vmul.f32 0.01, %v294_v19  ;;  %v298_v26 = vadd.f32 %v297_v23, %v3189_v14  ;;  %vm371_vm4 = vcmp.gt.f32.partialorder %v294_v19, 0.0 }
 0x186   :  { %vm372_vm3 = vcmp.gt.f32.partialorder %v296_v22, 0.0  ;;  %v404_v27 = vmul.f32 0.01, %v296_v22  ;;  %v434_v29 = vsel %vm370_vm2, %v292_v16, %v402_v21 }
 0x187   :  { %v405_v28 = vmul.f32 0.01, %v298_v26  ;;  %vm373_vm5 = vcmp.gt.f32.partialorder %v298_v26, 0.0  ;;  %v435_v33 = vsel %vm371_vm4, %v294_v19, %v403_v24 }
 0x188   :  { %v436_v30 = vsel %vm372_vm3, %v296_v22, %v404_v27 }
 0x189   :  { %v301_v31 = vpop.f32.mrb[4].mxu0  ;;  %v437_v34 = vsel %vm373_vm5, %v298_v26, %v405_v28  ;;  %v466_v35 = vpack.c.bf16 %v436_v30, %v434_v29 }
 0x18a   :  { %v302_v36 = vadd.f32 %v301_v31, %v3186_v13  ;;  %v303_v37 = vpop.f32.mrb[5].mxu0  ;;  %v467_v38 = vpack.c.bf16 %v437_v34, %v435_v33 }
 0x18b   :  { %v304_v40 = vadd.f32 %v303_v37, %v3189_v14  ;;  %v305_v41 = vpop.f32.mrb[6].mxu0 }
 0x18c   :  { %v406_v42 = vmul.f32 0.01, %v302_v36  ;;  %v306_v43 = vadd.f32 %v305_v41, %v3186_v13  ;;  %v307_v45 = vpop.f32.mrb[7].mxu0  ;;  %2370 = vmatprep.mubr.msk.bf16.mxu1 %vm643_vm6, %v467_v38  ;;  %vm374_vm7 = vcmp.gt.f32.partialorder %v302_v36, 0.0 }
 0x18d   :  { %v407_v46 = vmul.f32 0.01, %v304_v40  ;;  %v308_v48 = vadd.f32 %v307_v45, %v3189_v14  ;;  %708 = vmatmul.mubr.bf16.vlgmr.msra.gmra.mrb[0].mxu1 %v466_v35  ;;  %vm375_vm8 = vcmp.gt.f32.partialorder %v304_v40, 0.0 }
 0x18e   :  { %vm376_vm9 = vcmp.gt.f32.partialorder %v306_v43, 0.0  ;;  %v408_v49 = vmul.f32 0.01, %v306_v43  ;;  %v438_v52 = vsel %vm374_vm7, %v302_v36, %v406_v42 }
 0x18f   :  { %vm377_vm10 = vcmp.gt.f32.partialorder %v308_v48, 0.0  ;;  %v409_v51 = vmul.f32 0.01, %v308_v48  ;;  %v439_v54 = vsel %vm375_vm8, %v304_v40, %v407_v46 }
 0x190   :  { %v440_v53 = vsel %vm376_vm9, %v306_v43, %v408_v49 }
 0x191   :  { %v441_v55 = vsel %vm377_vm10, %v308_v48, %v409_v51  ;;  %v311_v56 = vpop.f32.mrb[8].mxu0  ;;  %v468_v57 = vpack.c.bf16 %v440_v53, %v438_v52 }
 0x192   :  { %v469_v58 = vpack.c.bf16 %v441_v55, %v439_v54  ;;  %v312_v59 = vadd.f32 %v311_v56, %v3186_v13  ;;  %v313_v60 = vpop.f32.mrb[9].mxu0 }
 0x193   :  { %v314_v61 = vadd.f32 %v313_v60, %v3189_v14  ;;  %v315_v62 = vpop.f32.mrb[10].mxu0 }
 0x194   :  { %v410_v63 = vmul.f32 0.01, %v312_v59  ;;  %v316_v0 = vadd.f32 %v315_v62, %v3186_v13  ;;  %v317_v1 = vpop.f32.mrb[11].mxu0  ;;  %2371 = vmatprep.mubr.msk.bf16.mxu1 %vm643_vm6, %v469_v58  ;;  %vm378_vm11 = vcmp.gt.f32.partialorder %v312_v59, 0.0 }
 0x195   :  { %v411_v3 = vmul.f32 0.01, %v314_v61  ;;  %v318_v4 = vadd.f32 %v317_v1, %v3189_v14  ;;  %718 = vmatmul.mubr.bf16.gmra.mrb[4].mxu1 %v468_v57  ;;  %vm379_vm12 = vcmp.gt.f32.partialorder %v314_v61, 0.0 }
 0x196   :  { %vm380_vm13 = vcmp.gt.f32.partialorder %v316_v0, 0.0  ;;  %v412_v5 = vmul.f32 0.01, %v316_v0  ;;  %v442_v7 = vsel %vm378_vm11, %v312_v59, %v410_v63 }
 0x197   :  { %vm381_vm14 = vcmp.gt.f32.partialorder %v318_v4, 0.0  ;;  %v413_v6 = vmul.f32 0.01, %v318_v4  ;;  %v443_v11 = vsel %vm379_vm12, %v314_v61, %v411_v3 }
 0x198   :  { %v444_v8 = vsel %vm380_vm13, %v316_v0, %v412_v5 }
 0x199   :  { %v445_v15 = vsel %vm381_vm14, %v318_v4, %v413_v6  ;;  %v321_v16 = vpop.f32.mrb[12].mxu0  ;;  %v470_v18 = vpack.c.bf16 %v444_v8, %v442_v7 }
 0x19a   :  { %v471_v19 = vpack.c.bf16 %v445_v15, %v443_v11  ;;  %v322_v20 = vadd.f32 %v321_v16, %v3186_v13  ;;  %v323_v21 = vpop.f32.mrb[13].mxu0 }
 0x19b   :  { %v324_v22 = vadd.f32 %v323_v21, %v3189_v14  ;;  %v325_v23 = vpop.f32.mrb[14].mxu0 }
 0x19c   :  { %v414_v24 = vmul.f32 0.01, %v322_v20  ;;  %v326_v26 = vadd.f32 %v325_v23, %v3186_v13  ;;  %v327_v27 = vpop.f32.mrb[15].mxu0  ;;  %2372 = vmatprep.mubr.msk.bf16.mxu1 %vm643_vm6, %v471_v19  ;;  %vm382_vm15 = vcmp.gt.f32.partialorder %v322_v20, 0.0 }
 0x19d   :  { %v415_v28 = vmul.f32 0.01, %v324_v22  ;;  %v328_v29 = vadd.f32 %v327_v27, %v3189_v14  ;;  %728 = vmatmul.mubr.bf16.gmra.mrb[8].mxu1 %v470_v18  ;;  %vm383_vm2 = vcmp.gt.f32.partialorder %v324_v22, 0.0 }
 0x19e   :  { %vm384_vm3 = vcmp.gt.f32.partialorder %v326_v26, 0.0  ;;  %v416_v30 = vmul.f32 0.01, %v326_v26  ;;  %v446_v33 = vsel %vm382_vm15, %v322_v20, %v414_v24 }
 0x19f   :  { %vm385_vm4 = vcmp.gt.f32.partialorder %v328_v29, 0.0  ;;  %v417_v31 = vmul.f32 0.01, %v328_v29  ;;  %v447_v35 = vsel %vm383_vm2, %v324_v22, %v415_v28 }
 0x1a0   :  { %v448_v34 = vsel %vm384_vm3, %v326_v26, %v416_v30 }
 0x1a1   :  { %v449_v36 = vsel %vm385_vm4, %v328_v29, %v417_v31  ;;  %v331_v37 = vpop.f32.mrb[16].mxu0  ;;  %v472_v38 = vpack.c.bf16 %v448_v34, %v446_v33 }
 0x1a2   :  { %v473_v40 = vpack.c.bf16 %v449_v36, %v447_v35  ;;  %v332_v41 = vadd.f32 %v331_v37, %v3186_v13  ;;  %v333_v42 = vpop.f32.mrb[17].mxu0 }
 0x1a3   :  { %v334_v43 = vadd.f32 %v333_v42, %v3189_v14  ;;  %v335_v45 = vpop.f32.mrb[18].mxu0 }
 0x1a4   :  { %v418_v46 = vmul.f32 0.01, %v332_v41  ;;  %v336_v48 = vadd.f32 %v335_v45, %v3186_v13  ;;  %v337_v49 = vpop.f32.mrb[19].mxu0  ;;  %2373 = vmatprep.mubr.msk.bf16.mxu1 %vm643_vm6, %v473_v40  ;;  %vm386_vm5 = vcmp.gt.f32.partialorder %v332_v41, 0.0 }
 0x1a5   :  { %v419_v51 = vmul.f32 0.01, %v334_v43  ;;  %v338_v52 = vadd.f32 %v337_v49, %v3189_v14  ;;  %738 = vmatmul.mubr.bf16.gmra.mrb[12].mxu1 %v472_v38  ;;  %vm387_vm7 = vcmp.gt.f32.partialorder %v334_v43, 0.0 }
 0x1a6   :  { %vm388_vm8 = vcmp.gt.f32.partialorder %v336_v48, 0.0  ;;  %v420_v53 = vmul.f32 0.01, %v336_v48  ;;  %v450_v55 = vsel %vm386_vm5, %v332_v41, %v418_v46 }
 0x1a7   :  { %vm389_vm9 = vcmp.gt.f32.partialorder %v338_v52, 0.0  ;;  %v421_v54 = vmul.f32 0.01, %v338_v52  ;;  %v451_v57 = vsel %vm387_vm7, %v334_v43, %v419_v51 }
 0x1a8   :  { %v452_v56 = vsel %vm388_vm8, %v336_v48, %v420_v53 }
 0x1a9   :  { %v453_v58 = vsel %vm389_vm9, %v338_v52, %v421_v54  ;;  %v341_v59 = vpop.f32.mrb[20].mxu0  ;;  %v474_v60 = vpack.c.bf16 %v452_v56, %v450_v55 }
 0x1aa   :  { %v475_v61 = vpack.c.bf16 %v453_v58, %v451_v57  ;;  %v342_v62 = vadd.f32 %v341_v59, %v3186_v13  ;;  %v343_v63 = vpop.f32.mrb[21].mxu0 }
 0x1ab   :  { %v344_v0 = vadd.f32 %v343_v63, %v3189_v14  ;;  %v345_v1 = vpop.f32.mrb[22].mxu0 }
 0x1ac   :  { %v422_v3 = vmul.f32 0.01, %v342_v62  ;;  %v346_v4 = vadd.f32 %v345_v1, %v3186_v13  ;;  %v347_v5 = vpop.f32.mrb[23].mxu0  ;;  %2374 = vmatprep.mubr.msk.bf16.mxu1 %vm643_vm6, %v475_v61  ;;  %vm390_vm10 = vcmp.gt.f32.partialorder %v342_v62, 0.0  ;;  %v195_v1 = vld [vmem:[%s3537_s5] sm:$0x3] }
 0x1ad   :  { %v423_v6 = vmul.f32 0.01, %v344_v0  ;;  %v348_v7 = vadd.f32 %v347_v5, %v3189_v14  ;;  %748 = vmatmul.mubr.bf16.gmra.mrb[16].mxu1 %v474_v60  ;;  %vm391_vm11 = vcmp.gt.f32.partialorder %v344_v0, 0.0 }
 0x1ae   :  { %vm392_vm12 = vcmp.gt.f32.partialorder %v346_v4, 0.0  ;;  %v424_v8 = vmul.f32 0.01, %v346_v4  ;;  %v454_v15 = vsel %vm390_vm10, %v342_v62, %v422_v3  ;;  %v3237_v3 = vrot.slane %v195_v1, %v3178_v10 }
 0x1af   :  { %vm393_vm13 = vcmp.gt.f32.partialorder %v348_v7, 0.0  ;;  %v425_v11 = vmul.f32 0.01, %v348_v7  ;;  %v455_v18 = vsel %vm391_vm11, %v344_v0, %v423_v6 }
 0x1b0   :  { %v456_v16 = vsel %vm392_vm12, %v346_v4, %v424_v8  ;;  %v3240_v4 = vrot.slane %v195_v1, %v3183_v12 }
 0x1b1   :  { %v457_v19 = vsel %vm393_vm13, %v348_v7, %v425_v11  ;;  %v351_v20 = vpop.f32.mrb[24].mxu0  ;;  %v476_v21 = vpack.c.bf16 %v456_v16, %v454_v15 }
 0x1b2   :  { %v477_v22 = vpack.c.bf16 %v457_v19, %v455_v18  ;;  %v352_v23 = vadd.f32 %v351_v20, %v3186_v13  ;;  %v353_v24 = vpop.f32.mrb[25].mxu0 }
 0x1b3   :  { %v354_v26 = vadd.f32 %v353_v24, %v3189_v14  ;;  %v355_v27 = vpop.f32.mrb[26].mxu0 }
 0x1b4   :  { %v426_v28 = vmul.f32 0.01, %v352_v23  ;;  %v356_v29 = vadd.f32 %v355_v27, %v3186_v13  ;;  %v357_v30 = vpop.f32.mrb[27].mxu0  ;;  %2375 = vmatprep.mubr.msk.bf16.mxu1 %vm643_vm6, %v477_v22  ;;  %vm394_vm14 = vcmp.gt.f32.partialorder %v352_v23, 0.0 }
 0x1b5   :  { %v427_v31 = vmul.f32 0.01, %v354_v26  ;;  %v358_v33 = vadd.f32 %v357_v30, %v3189_v14  ;;  %758 = vmatmul.mubr.bf16.gmra.mrb[20].mxu1 %v476_v21  ;;  %vm395_vm15 = vcmp.gt.f32.partialorder %v354_v26, 0.0 }
 0x1b6   :  { %vm396_vm2 = vcmp.gt.f32.partialorder %v356_v29, 0.0  ;;  %v428_v34 = vmul.f32 0.01, %v356_v29  ;;  %v458_v36 = vsel %vm394_vm14, %v352_v23, %v426_v28 }
 0x1b7   :  { %vm397_vm3 = vcmp.gt.f32.partialorder %v358_v33, 0.0  ;;  %v429_v35 = vmul.f32 0.01, %v358_v33  ;;  %v459_v38 = vsel %vm395_vm15, %v354_v26, %v427_v31 }
 0x1b8   :  { %v460_v37 = vsel %vm396_vm2, %v356_v29, %v428_v34 }
 0x1b9   :  { %v461_v40 = vsel %vm397_vm3, %v358_v33, %v429_v35  ;;  %v361_v41 = vpop.f32.mrb[28].mxu0  ;;  %v478_v42 = vpack.c.bf16 %v460_v37, %v458_v36 }
 0x1ba   :  { %v479_v43 = vpack.c.bf16 %v461_v40, %v459_v38  ;;  %v362_v45 = vadd.f32 %v361_v41, %v3186_v13  ;;  %v363_v46 = vpop.f32.mrb[29].mxu0 }
 0x1bb   :  { %v364_v48 = vadd.f32 %v363_v46, %v3189_v14  ;;  %v365_v49 = vpop.f32.mrb[30].mxu0 }
 0x1bc   :  { %v430_v51 = vmul.f32 0.01, %v362_v45  ;;  %v366_v52 = vadd.f32 %v365_v49, %v3186_v13  ;;  %v367_v53 = vpop.f32.mrb[31].mxu0  ;;  %2376 = vmatprep.mubr.msk.bf16.mxu1 %vm643_vm6, %v479_v43  ;;  %vm398_vm4 = vcmp.gt.f32.partialorder %v362_v45, 0.0  ;;  %v2601_v13 = vld [vmem:[#allocation10 + $0x58] sm:$0xff]  }
 0x1bd   :  { %v431_v54 = vmul.f32 0.01, %v364_v48  ;;  %v368_v55 = vadd.f32 %v367_v53, %v3189_v14  ;;  %768 = vmatmul.mubr.bf16.gmra.mrb[24].mxu1 %v478_v42  ;;  %vm399_vm5 = vcmp.gt.f32.partialorder %v364_v48, 0.0  ;;  %1056 = vmatpush1.bf16.msra.mxu0 %v2601_v13  ;;  %v2602_v14 = vld [vmem:[#allocation10 + $0x60] ss:$0 sps:$4 sm:$0xff]  }
 0x1be   :  { %vm400_vm7 = vcmp.gt.f32.partialorder %v366_v52, 0.0  ;;  %v432_v56 = vmul.f32 0.01, %v366_v52  ;;  %v462_v58 = vsel %vm398_vm4, %v362_v45, %v430_v51  ;;  %1057 = vmatprep.subr.bf16.mxu0 %v2882_v2  ;;  %v1031_v0 = vsel %vm668_vm1, %v2602_v14, 0 }
 0x1bf   :  { %vm401_vm8 = vcmp.gt.f32.partialorder %v368_v55, 0.0  ;;  %v433_v57 = vmul.f32 0.01, %v368_v55  ;;  %v463_v60 = vsel %vm399_vm5, %v364_v48, %v431_v54 }
 0x1c0   :  { %v464_v59 = vsel %vm400_vm7, %v366_v52, %v432_v56 }
 0x1c1   :  { %v465_v61 = vsel %vm401_vm8, %v368_v55, %v433_v57  ;;  %v480_v62 = vpack.c.bf16 %v464_v59, %v462_v58  ;;  %1058 = vmatpush1.bf16.msra.mxu0 %v1031_v0 }
 0x1c2   :  { %v481_v63 = vpack.c.bf16 %v465_v61, %v463_v60 }
 0x1c4   :  { %2377 = vmatprep.mubr.msk.bf16.mxu1 %vm643_vm6, %v481_v63 }
 0x1c5   :  { %778 = vmatmul.mubr.bf16.gmra.mrb[28].mxu1 %v480_v62 }
 0x260   :  { %v709_v5 = vpop.f32.mrb[0].mxu1 }
 0x261   :  { %v710_v6 = vadd.f32 %v709_v5, %v3237_v3  ;;  %v711_v7 = vpop.f32.mrb[1].mxu1 }
 0x262   :  { %v712_v8 = vadd.f32 %v711_v7, %v3240_v4  ;;  %v713_v11 = vpop.f32.mrb[2].mxu1 }
 0x263   :  { %v820_v15 = vmul.f32 0.01, %v710_v6  ;;  %v714_v16 = vadd.f32 %v713_v11, %v3237_v3  ;;  %v715_v18 = vpop.f32.mrb[3].mxu1  ;;  %vm788_vm9 = vcmp.gt.f32.partialorder %v710_v6, 0.0 }
 0x264   :  { %v821_v19 = vmul.f32 0.01, %v712_v8  ;;  %v716_v20 = vadd.f32 %v715_v18, %v3240_v4  ;;  %vm789_vm10 = vcmp.gt.f32.partialorder %v712_v8, 0.0 }
 0x265   :  { %vm790_vm11 = vcmp.gt.f32.partialorder %v714_v16, 0.0  ;;  %v822_v21 = vmul.f32 0.01, %v714_v16  ;;  %v852_v23 = vsel %vm788_vm9, %v710_v6, %v820_v15 }
 0x266   :  { %vm791_vm12 = vcmp.gt.f32.partialorder %v716_v20, 0.0  ;;  %v823_v22 = vmul.f32 0.01, %v716_v20  ;;  %v853_v26 = vsel %vm789_vm10, %v712_v8, %v821_v19 }
 0x267   :  { %v854_v24 = vsel %vm790_vm11, %v714_v16, %v822_v21 }
 0x268   :  { %v884_v27 = vpack.c.bf16 %v854_v24, %v852_v23  ;;  %v855_v28 = vsel %vm791_vm12, %v716_v20, %v823_v22  ;;  %v719_v29 = vpop.f32.mrb[4].mxu1 }
 0x269   :  { %v885_v30 = vpack.c.bf16 %v855_v28, %v853_v26  ;;  %v720_v31 = vadd.f32 %v719_v29, %v3237_v3  ;;  %v721_v33 = vpop.f32.mrb[5].mxu1 }
 0x26a   :  { %v722_v34 = vadd.f32 %v721_v33, %v3240_v4  ;;  %v723_v35 = vpop.f32.mrb[6].mxu1 }
 0x26b   :  { %v824_v36 = vmul.f32 0.01, %v720_v31  ;;  %v724_v37 = vadd.f32 %v723_v35, %v3237_v3  ;;  %v725_v38 = vpop.f32.mrb[7].mxu1  ;;  %2392 = vmatprep.mubr.msk.bf16.mxu0 %vm643_vm6, %v885_v30  ;;  %vm792_vm13 = vcmp.gt.f32.partialorder %v720_v31, 0.0 }
 0x26c   :  { %v825_v40 = vmul.f32 0.01, %v722_v34  ;;  %v726_v41 = vadd.f32 %v725_v38, %v3240_v4  ;;  %1066 = vmatmul.mubr.bf16.vlgmr.msra.gmra.mrb[32].mxu0 %v884_v27  ;;  %vm793_vm14 = vcmp.gt.f32.partialorder %v722_v34, 0.0 }
 0x26d   :  { %vm794_vm15 = vcmp.gt.f32.partialorder %v724_v37, 0.0  ;;  %v826_v42 = vmul.f32 0.01, %v724_v37  ;;  %v856_v45 = vsel %vm792_vm13, %v720_v31, %v824_v36 }
 0x26e   :  { %vm795_vm2 = vcmp.gt.f32.partialorder %v726_v41, 0.0  ;;  %v827_v43 = vmul.f32 0.01, %v726_v41  ;;  %v857_v48 = vsel %vm793_vm14, %v722_v34, %v825_v40 }
 0x26f   :  { %v858_v46 = vsel %vm794_vm15, %v724_v37, %v826_v42 }
 0x270   :  { %v859_v49 = vsel %vm795_vm2, %v726_v41, %v827_v43  ;;  %v729_v51 = vpop.f32.mrb[8].mxu1  ;;  %v886_v52 = vpack.c.bf16 %v858_v46, %v856_v45 }
 0x271   :  { %v887_v53 = vpack.c.bf16 %v859_v49, %v857_v48  ;;  %v730_v54 = vadd.f32 %v729_v51, %v3237_v3  ;;  %v731_v55 = vpop.f32.mrb[9].mxu1 }
 0x272   :  { %v732_v56 = vadd.f32 %v731_v55, %v3240_v4  ;;  %v733_v57 = vpop.f32.mrb[10].mxu1 }
 0x273   :  { %v828_v58 = vmul.f32 0.01, %v730_v54  ;;  %v734_v59 = vadd.f32 %v733_v57, %v3237_v3  ;;  %v735_v60 = vpop.f32.mrb[11].mxu1  ;;  %2393 = vmatprep.mubr.msk.bf16.mxu0 %vm643_vm6, %v887_v53  ;;  %vm796_vm3 = vcmp.gt.f32.partialorder %v730_v54, 0.0 }
 0x274   :  { %v829_v61 = vmul.f32 0.01, %v732_v56  ;;  %v736_v62 = vadd.f32 %v735_v60, %v3240_v4  ;;  %1074 = vmatmul.mubr.bf16.gmra.mrb[36].mxu0 %v886_v52  ;;  %vm797_vm4 = vcmp.gt.f32.partialorder %v732_v56, 0.0 }
 0x275   :  { %vm798_vm5 = vcmp.gt.f32.partialorder %v734_v59, 0.0  ;;  %v830_v63 = vmul.f32 0.01, %v734_v59  ;;  %v860_v14 = vsel %vm796_vm3, %v730_v54, %v828_v58 }
 0x276   :  { %vm799_vm7 = vcmp.gt.f32.partialorder %v736_v62, 0.0  ;;  %v831_v13 = vmul.f32 0.01, %v736_v62  ;;  %v861_v1 = vsel %vm797_vm4, %v732_v56, %v829_v61 }
 0x277   :  { %v862_v0 = vsel %vm798_vm5, %v734_v59, %v830_v63 }
 0x278   :  { %v863_v5 = vsel %vm799_vm7, %v736_v62, %v831_v13  ;;  %v739_v6 = vpop.f32.mrb[12].mxu1  ;;  %v888_v7 = vpack.c.bf16 %v862_v0, %v860_v14 }
 0x279   :  { %v889_v8 = vpack.c.bf16 %v863_v5, %v861_v1  ;;  %v740_v11 = vadd.f32 %v739_v6, %v3237_v3  ;;  %v741_v15 = vpop.f32.mrb[13].mxu1 }
 0x27a   :  { %v742_v16 = vadd.f32 %v741_v15, %v3240_v4  ;;  %v743_v18 = vpop.f32.mrb[14].mxu1 }
 0x27b   :  { %v832_v19 = vmul.f32 0.01, %v740_v11  ;;  %v744_v20 = vadd.f32 %v743_v18, %v3237_v3  ;;  %v745_v21 = vpop.f32.mrb[15].mxu1  ;;  %2394 = vmatprep.mubr.msk.bf16.mxu0 %vm643_vm6, %v889_v8  ;;  %vm800_vm8 = vcmp.gt.f32.partialorder %v740_v11, 0.0 }
 0x27c   :  { %v833_v22 = vmul.f32 0.01, %v742_v16  ;;  %v746_v23 = vadd.f32 %v745_v21, %v3240_v4  ;;  %1082 = vmatmul.mubr.bf16.gmra.mrb[40].mxu0 %v888_v7  ;;  %vm801_vm9 = vcmp.gt.f32.partialorder %v742_v16, 0.0 }
 0x27d   :  { %vm802_vm10 = vcmp.gt.f32.partialorder %v744_v20, 0.0  ;;  %v834_v24 = vmul.f32 0.01, %v744_v20  ;;  %v864_v27 = vsel %vm800_vm8, %v740_v11, %v832_v19 }
 0x27e   :  { %vm803_vm11 = vcmp.gt.f32.partialorder %v746_v23, 0.0  ;;  %v835_v26 = vmul.f32 0.01, %v746_v23  ;;  %v865_v29 = vsel %vm801_vm9, %v742_v16, %v833_v22 }
 0x27f   :  { %v866_v28 = vsel %vm802_vm10, %v744_v20, %v834_v24 }
 0x280   :  { %v867_v30 = vsel %vm803_vm11, %v746_v23, %v835_v26  ;;  %v749_v31 = vpop.f32.mrb[16].mxu1  ;;  %v890_v33 = vpack.c.bf16 %v866_v28, %v864_v27 }
 0x281   :  { %v891_v34 = vpack.c.bf16 %v867_v30, %v865_v29  ;;  %v750_v35 = vadd.f32 %v749_v31, %v3237_v3  ;;  %v751_v36 = vpop.f32.mrb[17].mxu1 }
 0x282   :  { %v752_v37 = vadd.f32 %v751_v36, %v3240_v4  ;;  %v753_v38 = vpop.f32.mrb[18].mxu1 }
 0x283   :  { %v836_v40 = vmul.f32 0.01, %v750_v35  ;;  %v754_v41 = vadd.f32 %v753_v38, %v3237_v3  ;;  %v755_v42 = vpop.f32.mrb[19].mxu1  ;;  %2395 = vmatprep.mubr.msk.bf16.mxu0 %vm643_vm6, %v891_v34  ;;  %vm804_vm12 = vcmp.gt.f32.partialorder %v750_v35, 0.0 }
 0x284   :  { %v837_v43 = vmul.f32 0.01, %v752_v37  ;;  %v756_v45 = vadd.f32 %v755_v42, %v3240_v4  ;;  %1090 = vmatmul.mubr.bf16.gmra.mrb[44].mxu0 %v890_v33  ;;  %vm805_vm13 = vcmp.gt.f32.partialorder %v752_v37, 0.0 }
 0x285   :  { %vm806_vm14 = vcmp.gt.f32.partialorder %v754_v41, 0.0  ;;  %v838_v46 = vmul.f32 0.01, %v754_v41  ;;  %v868_v49 = vsel %vm804_vm12, %v750_v35, %v836_v40 }
 0x286   :  { %vm807_vm15 = vcmp.gt.f32.partialorder %v756_v45, 0.0  ;;  %v839_v48 = vmul.f32 0.01, %v756_v45  ;;  %v869_v52 = vsel %vm805_vm13, %v752_v37, %v837_v43 }
 0x287   :  { %v870_v51 = vsel %vm806_vm14, %v754_v41, %v838_v46 }
 0x288   :  { %v871_v53 = vsel %vm807_vm15, %v756_v45, %v839_v48  ;;  %v759_v54 = vpop.f32.mrb[20].mxu1  ;;  %v892_v55 = vpack.c.bf16 %v870_v51, %v868_v49  ;;  %vm2884_vm15 = vmmov 0  }
 0x289   :  { %v893_v56 = vpack.c.bf16 %v871_v53, %v869_v52  ;;  %v760_v57 = vadd.f32 %v759_v54, %v3237_v3  ;;  %v761_v58 = vpop.f32.mrb[21].mxu1 }
 0x28a   :  { %v762_v59 = vadd.f32 %v761_v58, %v3240_v4  ;;  %v763_v60 = vpop.f32.mrb[22].mxu1 }
 0x28b   :  { %v840_v61 = vmul.f32 0.01, %v760_v57  ;;  %v764_v62 = vadd.f32 %v763_v60, %v3237_v3  ;;  %v765_v63 = vpop.f32.mrb[23].mxu1  ;;  %2396 = vmatprep.mubr.msk.bf16.mxu0 %vm643_vm6, %v893_v56  ;;  %vm808_vm2 = vcmp.gt.f32.partialorder %v760_v57, 0.0 }
 0x28c   :  { %v841_v13 = vmul.f32 0.01, %v762_v59  ;;  %v766_v14 = vadd.f32 %v765_v63, %v3240_v4  ;;  %1098 = vmatmul.mubr.bf16.gmra.mrb[48].mxu0 %v892_v55  ;;  %vm809_vm3 = vcmp.gt.f32.partialorder %v762_v59, 0.0 }
 0x28d   :  { %vm810_vm4 = vcmp.gt.f32.partialorder %v764_v62, 0.0  ;;  %v842_v0 = vmul.f32 0.01, %v764_v62  ;;  %v872_v5 = vsel %vm808_vm2, %v760_v57, %v840_v61 }
 0x28e   :  { %vm811_vm5 = vcmp.gt.f32.partialorder %v766_v14, 0.0  ;;  %v843_v1 = vmul.f32 0.01, %v766_v14  ;;  %v873_v7 = vsel %vm809_vm3, %v762_v59, %v841_v13 }
 0x28f   :  { %v874_v6 = vsel %vm810_vm4, %v764_v62, %v842_v0  ;;  %vm1197_vm4 = vcmask 818176  }
 0x290   :  { %v875_v8 = vsel %vm811_vm5, %v766_v14, %v843_v1  ;;  %v769_v11 = vpop.f32.mrb[24].mxu1  ;;  %v894_v15 = vpack.c.bf16 %v874_v6, %v872_v5 }
 0x291   :  { %v895_v16 = vpack.c.bf16 %v875_v8, %v873_v7  ;;  %v770_v18 = vadd.f32 %v769_v11, %v3237_v3  ;;  %v771_v19 = vpop.f32.mrb[25].mxu1 }
 0x292   :  { %v772_v20 = vadd.f32 %v771_v19, %v3240_v4  ;;  %v773_v21 = vpop.f32.mrb[26].mxu1  ;;  %v2609_v19 = vld [vmem:[#allocation15] ss:$8 sps:$4 sm:$0xff]  }
 0x293   :  { %v844_v22 = vmul.f32 0.01, %v770_v18  ;;  %v774_v23 = vadd.f32 %v773_v21, %v3237_v3  ;;  %v775_v24 = vpop.f32.mrb[27].mxu1  ;;  %2397 = vmatprep.mubr.msk.bf16.mxu0 %vm643_vm6, %v895_v16  ;;  %vm812_vm7 = vcmp.gt.f32.partialorder %v770_v18, 0.0 }
 0x294   :  { %v845_v26 = vmul.f32 0.01, %v772_v20  ;;  %v776_v27 = vadd.f32 %v775_v24, %v3240_v4  ;;  %1106 = vmatmul.mubr.bf16.gmra.mrb[52].mxu0 %v894_v15  ;;  %vm813_vm8 = vcmp.gt.f32.partialorder %v772_v20, 0.0  ;;  %v2614_v24 = vld [vmem:[#allocation15 + $0x14] ss:$8 sps:$4 sm:$0xff]  }
 0x295   :  { %vm814_vm9 = vcmp.gt.f32.partialorder %v774_v23, 0.0  ;;  %v846_v28 = vmul.f32 0.01, %v774_v23  ;;  %v876_v30 = vsel %vm812_vm7, %v770_v18, %v844_v22  ;;  %v1187_v18 = vld [vmem:[#allocation2] sm:$0x1] }
 0x296   :  { %vm815_vm10 = vcmp.gt.f32.partialorder %v776_v27, 0.0  ;;  %v847_v29 = vmul.f32 0.01, %v776_v27  ;;  %v877_v33 = vsel %vm813_vm8, %v772_v20, %v845_v26  ;;  %1190 = vperm.xlu0 %2545, %v1187_v18  }
 0x297   :  { %v878_v31 = vsel %vm814_vm9, %v774_v23, %v846_v28  ;;  %v2611_v23 = vld [vmem:[#allocation15 + $0x4] ss:$8 sps:$4 sm:$0xff]  }
 0x298   :  { %v879_v34 = vsel %vm815_vm10, %v776_v27, %v847_v29  ;;  %v779_v35 = vpop.f32.mrb[28].mxu1  ;;  %v896_v36 = vpack.c.bf16 %v878_v31, %v876_v30  ;;  %1719 = vmatprep.subr.bf16.mxu0 %v2611_v23  ;;  %v2612_v27 = vld [vmem:[#allocation15 + $0x10] ss:$8 sps:$4 sm:$0xff]   ;;  %v2617_v30 = vld [vmem:[#allocation15 + $0x24] ss:$8 sps:$4 sm:$0xff]  }
 0x299   :  { %v897_v37 = vpack.c.bf16 %v879_v34, %v877_v33  ;;  %v780_v38 = vadd.f32 %v779_v35, %v3237_v3  ;;  %v781_v40 = vpop.f32.mrb[29].mxu1  ;;  %1720 = vmatpush1.bf16.msra.mxu0 %v2609_v19  ;;  %v2630_v23 = vld [vmem:[#allocation15 + $0x70] ss:$8 sps:$4 sm:$0xff]  }
 0x29a   :  { %v782_v41 = vadd.f32 %v781_v40, %v3240_v4  ;;  %v783_v42 = vpop.f32.mrb[30].mxu1  ;;  %1721 = vmatprep.subr.bf16.mxu0 %v2614_v24 }
 0x29b   :  { %v848_v43 = vmul.f32 0.01, %v780_v38  ;;  %v784_v45 = vadd.f32 %v783_v42, %v3237_v3  ;;  %v785_v46 = vpop.f32.mrb[31].mxu1  ;;  %2398 = vmatprep.mubr.msk.bf16.mxu0 %vm643_vm6, %v897_v37  ;;  %vm816_vm11 = vcmp.gt.f32.partialorder %v780_v38, 0.0  ;;  %v2883_v3 = vmov 0.0  }
 0x29c   :  { %v849_v48 = vmul.f32 0.01, %v782_v41  ;;  %v786_v49 = vadd.f32 %v785_v46, %v3240_v4  ;;  %1114 = vmatmul.mubr.bf16.gmra.mrb[56].mxu0 %v896_v36  ;;  %vm817_vm12 = vcmp.gt.f32.partialorder %v782_v41, 0.0  ;;  %2489 = vmatprep.subr.bf16.mxu1 %v2883_v3  ;;  %v3285_v4 = vld [vmem:[#allocation12] ss:$0 sm:$0xff] }
 0x29d   :  { %vm818_vm13 = vcmp.gt.f32.partialorder %v784_v45, 0.0  ;;  %v850_v51 = vmul.f32 0.01, %v784_v45  ;;  %v880_v53 = vsel %vm816_vm11, %v780_v38, %v848_v43  ;;  %2505 = vmatprep.mubr.msk.bf16.mxu1 %vm2884_vm15, %v2883_v3  ;;  %1722 = vmatpush1.bf16.msra.mxu0 %v2612_v27  ;;  %v2615_v38 = vld [vmem:[#allocation15 + $0x20] ss:$8 sps:$4 sm:$0xff]  }
 0x29e   :  { %vm819_vm14 = vcmp.gt.f32.partialorder %v786_v49, 0.0  ;;  %v851_v52 = vmul.f32 0.01, %v786_v49  ;;  %v881_v55 = vsel %vm817_vm12, %v782_v41, %v849_v48  ;;  %1723 = vmatprep.subr.bf16.mxu0 %v2617_v30  ;;  %v2620_v43 = vld [vmem:[#allocation15 + $0x34] ss:$8 sps:$4 sm:$0xff]  }
 0x29f   :  { %v882_v54 = vsel %vm818_vm13, %v784_v45, %v850_v51  ;;  %v2618_v46 = vld [vmem:[#allocation15 + $0x30] ss:$8 sps:$4 sm:$0xff]   ;;  %v2623_v51 = vld [vmem:[#allocation15 + $0x44] ss:$8 sps:$4 sm:$0xff]  }
 0x2a0   :  { %v883_v56 = vsel %vm819_vm14, %v786_v49, %v851_v52  ;;  %v898_v57 = vpack.c.bf16 %v882_v54, %v880_v53  ;;  %v2635_v27 = vld [vmem:[#allocation15 + $0x84] ss:$8 sps:$4 sm:$0xff]  }
 0x2a1   :  { %v899_v58 = vpack.c.bf16 %v883_v56, %v881_v55  ;;  %1724 = vmatpush1.bf16.msra.mxu0 %v2615_v38 }
 0x2a2   :  { %1725 = vmatprep.subr.bf16.mxu0 %v2620_v43 }
 0x2a3   :  { %2399 = vmatprep.mubr.msk.bf16.mxu0 %vm643_vm6, %v899_v58  ;;  %v2621_v58 = vld [vmem:[#allocation15 + $0x40] ss:$8 sps:$4 sm:$0xff]  }
 0x2a4   :  { %1122 = vmatmul.mubr.bf16.gmra.mrb[60].mxu0 %v898_v57 }
 0x2a5   :  { %1726 = vmatpush1.bf16.msra.mxu0 %v2618_v46 }
 0x2a6   :  { %1727 = vmatprep.subr.bf16.mxu0 %v2623_v51 }
 0x2a9   :  { %1728 = vmatpush1.bf16.msra.mxu0 %v2621_v58 }
 0x33f   :  { %v1067_v59 = vpop.f32.mrb[32].mxu0 }
 0x340   :  { %v1068_v60 = vadd.f32 %v3285_v4, %v1067_v59  ;;  %v1069_v61 = vpop.f32.mrb[33].mxu0 }
 0x341   :  { %v1070_v62 = vpop.f32.mrb[34].mxu0 }
 0x342   :  { %v1146_v63 = vmul.f32 0.01, %v1068_v60  ;;  %v1071_v13 = vadd.f32 %v3285_v4, %v1070_v62  ;;  %v1072_v14 = vpop.f32.mrb[35].mxu0  ;;  %vm1130_vm2 = vcmp.gt.f32.partialorder %v1068_v60, 0.0  ;;  %v2626_v62 = vld [vmem:[#allocation15 + $0x54] ss:$8 sps:$4 sm:$0xff]  }
 0x343   :  { %1729 = vmatprep.subr.bf16.mxu0 %v2626_v62 }
 0x344   :  { %vm1131_vm3 = vcmp.gt.f32.partialorder %v1071_v13, 0.0  ;;  %v1147_v0 = vmul.f32 0.01, %v1071_v13  ;;  %v1162_v1 = vsel %vm1130_vm2, %v1068_v60, %v1146_v63 }
 0x346   :  { %v1163_v5 = vsel %vm1131_vm3, %v1071_v13, %v1147_v0  ;;  %v2624_v13 = vld [vmem:[#allocation15 + $0x50] ss:$8 sps:$4 sm:$0xff]  }
 0x347   :  { %v1075_v6 = vpop.f32.mrb[36].mxu0  ;;  %v1179_v7 = vpack.c.bf16 %v1163_v5, %v1162_v1  ;;  %v2629_v1 = vld [vmem:[#allocation15 + $0x64] ss:$8 sps:$4 sm:$0xff]   ;;  %1730 = vmatpush1.bf16.msra.mxu0 %v2624_v13 }
 0x348   :  { %v1076_v8 = vadd.f32 %v3285_v4, %v1075_v6  ;;  %v1077_v11 = vpop.f32.mrb[37].mxu0  ;;  %1731 = vmatprep.subr.bf16.mxu0 %v2629_v1 }
 0x349   :  { %v1078_v15 = vpop.f32.mrb[38].mxu0  ;;  %v1202_v16 = vsel %vm1197_vm4, %v1179_v7, 0 }
 0x34a   :  { %v1148_v20 = vmul.f32 0.01, %v1076_v8  ;;  %v1079_v21 = vadd.f32 %v3285_v4, %v1078_v15  ;;  %v1080_v22 = vpop.f32.mrb[39].mxu0  ;;  %2490 = vmatpush3.bf16.xpose.msra.mxu1 %v1202_v16  ;;  %vm1132_vm5 = vcmp.gt.f32.partialorder %v1076_v8, 0.0  ;;  %v2627_v16 = vld [vmem:[#allocation15 + $0x60] ss:$8 sps:$4 sm:$0xff]  }
 0x34b   :  { %2491 = vmatprep.subr.bf16.mxu1 %v2883_v3  ;;  %1732 = vmatpush1.bf16.msra.mxu0 %v2627_v16  ;;  %v2608_v16 = vld [vmem:[%s3542_s10 + $0x14] ss:$8 sps:$4 sm:$0xff]  }
 0x34c   :  { %vm1133_vm7 = vcmp.gt.f32.partialorder %v1079_v21, 0.0  ;;  %v1149_v26 = vmul.f32 0.01, %v1079_v21  ;;  %v1164_v28 = vsel %vm1132_vm5, %v1076_v8, %v1148_v20 }
 0x34e   :  { %v1165_v29 = vsel %vm1133_vm7, %v1079_v21, %v1149_v26  ;;  %v2632_v21 = vld [vmem:[#allocation15 + $0x74] ss:$8 sps:$4 sm:$0xff]  }
 0x34f   :  { %v1083_v31 = vpop.f32.mrb[40].mxu0  ;;  %v1180_v33 = vpack.c.bf16 %v1165_v29, %v1164_v28  ;;  %1733 = vmatprep.subr.bf16.mxu0 %v2632_v21 }
 0x350   :  { %v1084_v34 = vadd.f32 %v3285_v4, %v1083_v31  ;;  %v1085_v35 = vpop.f32.mrb[41].mxu0  ;;  %1734 = vmatpush1.bf16.msra.mxu0 %v2630_v23  ;;  %v2649_v23 = vld [vmem:[#allocation16 + $0x10] sm:$0xff]  }
 0x351   :  { %v1086_v36 = vpop.f32.mrb[42].mxu0  ;;  %v1205_v37 = vsel %vm1197_vm4, %v1180_v33, 0  ;;  %v2633_v35 = vld [vmem:[#allocation15 + $0x80] ss:$8 sps:$4 sm:$0xff]   ;;  %1735 = vmatprep.subr.bf16.mxu0 %v2635_v27  ;;  %v2652_v27 = vld [vmem:[#allocation16 + $0x28] sm:$0xff]  }
 0x352   :  { %v1150_v40 = vmul.f32 0.01, %v1084_v34  ;;  %v1087_v41 = vadd.f32 %v3285_v4, %v1086_v36  ;;  %v1088_v42 = vpop.f32.mrb[43].mxu0  ;;  %2492 = vmatpush3.bf16.xpose.msra.mxu1 %v1205_v37  ;;  %vm1134_vm8 = vcmp.gt.f32.partialorder %v1084_v34, 0.0 }
 0x353   :  { %2493 = vmatprep.subr.bf16.mxu1 %v2883_v3 }
 0x354   :  { %vm1135_vm9 = vcmp.gt.f32.partialorder %v1087_v41, 0.0  ;;  %v1151_v45 = vmul.f32 0.01, %v1087_v41  ;;  %v1166_v48 = vsel %vm1134_vm8, %v1084_v34, %v1150_v40  ;;  %1736 = vmatpush1.bf16.msra.mxu0 %v2633_v35 }
 0x356   :  { %v1167_v49 = vsel %vm1135_vm9, %v1087_v41, %v1151_v45 }
 0x357   :  { %v1091_v52 = vpop.f32.mrb[44].mxu0  ;;  %v1181_v53 = vpack.c.bf16 %v1167_v49, %v1166_v48 }
 0x358   :  { %v1092_v54 = vadd.f32 %v3285_v4, %v1091_v52  ;;  %v1093_v55 = vpop.f32.mrb[45].mxu0 }
 0x359   :  { %v1094_v56 = vpop.f32.mrb[46].mxu0  ;;  %v1208_v57 = vsel %vm1197_vm4, %v1181_v53, 0 }
 0x35a   :  { %v1152_v59 = vmul.f32 0.01, %v1092_v54  ;;  %v1095_v60 = vadd.f32 %v3285_v4, %v1094_v56  ;;  %v1096_v61 = vpop.f32.mrb[47].mxu0  ;;  %2494 = vmatpush3.bf16.xpose.msra.mxu1 %v1208_v57  ;;  %vm1136_vm10 = vcmp.gt.f32.partialorder %v1092_v54, 0.0 }
 0x35b   :  { %2495 = vmatprep.subr.bf16.mxu1 %v2883_v3 }
 0x35c   :  { %vm1137_vm11 = vcmp.gt.f32.partialorder %v1095_v60, 0.0  ;;  %v1153_v63 = vmul.f32 0.01, %v1095_v60  ;;  %v1168_v14 = vsel %vm1136_vm10, %v1092_v54, %v1152_v59 }
 0x35e   :  { %v1169_v0 = vsel %vm1137_vm11, %v1095_v60, %v1153_v63 }
 0x35f   :  { %v1099_v5 = vpop.f32.mrb[48].mxu0  ;;  %v1182_v6 = vpack.c.bf16 %v1169_v0, %v1168_v14 }
 0x360   :  { %v1100_v7 = vadd.f32 %v3285_v4, %v1099_v5  ;;  %v1101_v8 = vpop.f32.mrb[49].mxu0 }
 0x361   :  { %v1102_v11 = vpop.f32.mrb[50].mxu0  ;;  %v1211_v15 = vsel %vm1197_vm4, %v1182_v6, 0  ;;  %v2605_v8 = vld [vmem:[%s3542_s10 + $0x4] ss:$8 sps:$4 sm:$0xff]  }
 0x362   :  { %v1154_v18 = vmul.f32 0.01, %v1100_v7  ;;  %v1103_v19 = vadd.f32 %v3285_v4, %v1102_v11  ;;  %v1104_v20 = vpop.f32.mrb[51].mxu0  ;;  %2496 = vmatpush3.bf16.xpose.msra.mxu1 %v1211_v15  ;;  %vm1138_vm12 = vcmp.gt.f32.partialorder %v1100_v7, 0.0  ;;  %v1178_v15 = vld [vmem:[#allocation13] sm:$0x1] }
 0x363   :  { %2497 = vmatprep.subr.bf16.mxu1 %v2883_v3 }
 0x364   :  { %vm1139_vm13 = vcmp.gt.f32.partialorder %v1103_v19, 0.0  ;;  %v1155_v22 = vmul.f32 0.01, %v1103_v19  ;;  %v1170_v24 = vsel %vm1138_vm12, %v1100_v7, %v1154_v18  ;;  %v2606_v18 = vld [vmem:[%s3542_s10 + $0x10] ss:$8 sps:$4 sm:$0xff]  }
 0x366   :  { %v1171_v26 = vsel %vm1139_vm13, %v1103_v19, %v1155_v22  ;;  %v1552_v19 = vld [vmem:[#allocation15 + $0xc0] sm:$0xff]  ;;  %v2648_v22 = vld [vmem:[#allocation16 + $0x8] sm:$0xff]  }
 0x367   :  { %v1107_v28 = vpop.f32.mrb[52].mxu0  ;;  %v1183_v29 = vpack.c.bf16 %v1171_v26, %v1170_v24  ;;  %v2438_v20 = vcombine.high %v1552_v19, %v1552_v19  ;;  %v2650_v24 = vld [vmem:[#allocation16 + $0x18] sm:$0xff]   ;;  %v2651_v26 = vld [vmem:[#allocation16 + $0x20] sm:$0xff]  }
 0x368   :  { %v1108_v30 = vadd.f32 %v3285_v4, %v1107_v28  ;;  %v1109_v31 = vpop.f32.mrb[53].mxu0  ;;  %v2653_v28 = vld [vmem:[#allocation16 + $0x30] sm:$0xff]  }
 0x369   :  { %v1110_v33 = vpop.f32.mrb[54].mxu0  ;;  %v1214_v34 = vsel %vm1197_vm4, %v1183_v29, 0  ;;  %v2654_v29 = vld [vmem:[#allocation16 + $0x38] sm:$0xff]   ;;  %v2656_v31 = vld [vmem:[#allocation16 + $0x48] sm:$0xff]  }
 0x36a   :  { %v1156_v36 = vmul.f32 0.01, %v1108_v30  ;;  %v1111_v37 = vadd.f32 %v3285_v4, %v1110_v33  ;;  %v1112_v38 = vpop.f32.mrb[55].mxu0  ;;  %2498 = vmatpush3.bf16.xpose.msra.mxu1 %v1214_v34  ;;  %vm1140_vm14 = vcmp.gt.f32.partialorder %v1108_v30, 0.0  ;;  %v2657_v33 = vld [vmem:[#allocation16 + $0x50] sm:$0xff]  }
 0x36b   :  { %2499 = vmatprep.subr.bf16.mxu1 %v2883_v3 }
 0x36c   :  { %vm1141_vm2 = vcmp.gt.f32.partialorder %v1111_v37, 0.0  ;;  %v1157_v40 = vmul.f32 0.01, %v1111_v37  ;;  %v1172_v41 = vsel %vm1140_vm14, %v1108_v30, %v1156_v36  ;;  %v2655_v30 = vld [vmem:[#allocation16 + $0x40] sm:$0xff]  }
 0x36e   :  { %v1173_v42 = vsel %vm1141_vm2, %v1111_v37, %v1157_v40  ;;  %v1265_v37 = vld [vmem:[%s3543_s11] sm:$0x3] }
 0x36f   :  { %v1115_v43 = vpop.f32.mrb[56].mxu0  ;;  %v1184_v45 = vpack.c.bf16 %v1173_v42, %v1172_v41  ;;  %v3376_v40 = vrot.slane %v1265_v37, %v3178_v10  ;;  %v3379_v41 = vrot.slane %v1265_v37, %v3183_v12 }
 0x370   :  { %v1116_v46 = vadd.f32 %v3285_v4, %v1115_v43  ;;  %v1117_v48 = vpop.f32.mrb[57].mxu0 }
 0x371   :  { %v1118_v49 = vpop.f32.mrb[58].mxu0  ;;  %v1217_v51 = vsel %vm1197_vm4, %v1184_v45, 0 }
 0x372   :  { %v1158_v52 = vmul.f32 0.01, %v1116_v46  ;;  %v1119_v53 = vadd.f32 %v3285_v4, %v1118_v49  ;;  %v1120_v54 = vpop.f32.mrb[59].mxu0  ;;  %2500 = vmatpush3.bf16.xpose.msra.mxu1 %v1217_v51  ;;  %vm1142_vm3 = vcmp.gt.f32.partialorder %v1116_v46, 0.0 }
 0x373   :  { %2501 = vmatprep.subr.bf16.mxu1 %v2883_v3 }
 0x374   :  { %vm1143_vm5 = vcmp.gt.f32.partialorder %v1119_v53, 0.0  ;;  %v1159_v55 = vmul.f32 0.01, %v1119_v53  ;;  %v1174_v56 = vsel %vm1142_vm3, %v1116_v46, %v1158_v52 }
 0x376   :  { %v1175_v57 = vsel %vm1143_vm5, %v1119_v53, %v1159_v55 }
 0x377   :  { %v1123_v58 = vpop.f32.mrb[60].mxu0  ;;  %v1185_v59 = vpack.c.bf16 %v1175_v57, %v1174_v56 }
 0x378   :  { %v1124_v60 = vadd.f32 %v3285_v4, %v1123_v58  ;;  %v1125_v61 = vpop.f32.mrb[61].mxu0 }
 0x379   :  { %v1126_v62 = vpop.f32.mrb[62].mxu0  ;;  %v1220_v63 = vsel %vm1197_vm4, %v1185_v59, 0 }
 0x37a   :  { %v1160_v13 = vmul.f32 0.01, %v1124_v60  ;;  %v1127_v14 = vadd.f32 %v3285_v4, %v1126_v62  ;;  %v1128_v0 = vpop.f32.mrb[63].mxu0  ;;  %2502 = vmatpush3.bf16.xpose.msra.mxu1 %v1220_v63  ;;  %vm1144_vm7 = vcmp.gt.f32.partialorder %v1124_v60, 0.0  ;;  %v2603_v4 = vld [vmem:[%s3542_s10] ss:$8 sps:$4 sm:$0xff]  }
 0x37b   :  { %2503 = vmatprep.subr.bf16.mxu1 %v2883_v3 }
 0x37c   :  { %vm1145_vm8 = vcmp.gt.f32.partialorder %v1127_v14, 0.0  ;;  %v1161_v1 = vmul.f32 0.01, %v1127_v14  ;;  %v1176_v5 = vsel %vm1144_vm7, %v1124_v60, %v1160_v13 }
 0x37e   :  { %v1177_v6 = vsel %vm1145_vm8, %v1127_v14, %v1161_v1 }
 0x37f   :  { %v1186_v7 = vpack.c.bf16 %v1177_v6, %v1176_v5 }
 0x381   :  { %v1223_v11 = vsel %vm1197_vm4, %v1186_v7, 0 }
 0x382   :  { %2504 = vmatpush3.bf16.xpose.msra.mxu1 %v1223_v11 }
 0x383   :  { %1303 = vmatprep.subr.bf16.mxu1 %v2605_v8 }
 0x389   :  { %2506 = vmatmul.mubr.msk.bf16.vlgmr.msra.gmra.mrb[32].mxu1 %vm1197_vm4, %v1178_v15 }
 0x38a   :  { %1304 = vmatpush1.bf16.msra.mxu1 %v2603_v4  ;;  %1335 = vmatprep.mubr.bf16.mxu1 %v2882_v2 }
 0x38b   :  { %1305 = vmatprep.subr.bf16.mxu1 %v2608_v16 }
 0x38e   :  { %1306 = vmatpush1.bf16.msra.mxu1 %v2606_v18 }
 0x38f   :  { %2077 = vmatprep.subr.bf16.mxu1 %v2882_v2 }
 0x391   :  { %2405 = vmatmul.mubr.msk.bf16.vlgmr.msra.gmra.mrb[36].mxu1 %vm232_vm0, %v3125_v9  ;;  %v2636_v9 = vld [vmem:[#allocation15 + $0x90] ss:$8 sps:$4 sm:$0xff]  }
 0x392   :  { %1345 = vmatprep.mubr.bf16.mxu1 %v2882_v2 }
 0x399   :  { %2406 = vmatmul.mubr.msk.bf16.gmra.mrb[40].mxu1 %vm232_vm0, %v3131_v17  ;;  %v2638_v17 = vld [vmem:[#allocation15 + $0x94] ss:$8 sps:$4 sm:$0xff]  }
 0x39a   :  { %1355 = vmatprep.mubr.bf16.mxu1 %v2882_v2  ;;  %1737 = vmatprep.subr.bf16.mxu0 %v2638_v17 }
 0x39b   :  { %1738 = vmatpush1.bf16.msra.mxu0 %v2636_v9 }
 0x3a1   :  { %2407 = vmatmul.mubr.msk.bf16.gmra.mrb[44].mxu1 %vm232_vm0, %v3136_v25  ;;  %v2641_v25 = vld [vmem:[#allocation15 + $0xa4] ss:$8 sps:$4 sm:$0xff]  }
 0x3a2   :  { %1365 = vmatprep.mubr.bf16.mxu1 %v2882_v2  ;;  %1739 = vmatprep.subr.bf16.mxu0 %v2641_v25 }
 0x3a9   :  { %2408 = vmatmul.mubr.msk.bf16.gmra.mrb[48].mxu1 %vm232_vm0, %v3141_v32  ;;  %v2639_v32 = vld [vmem:[#allocation15 + $0xa0] ss:$8 sps:$4 sm:$0xff]  }
 0x3aa   :  { %1375 = vmatprep.mubr.bf16.mxu1 %v2882_v2  ;;  %1740 = vmatpush1.bf16.msra.mxu0 %v2639_v32 }
 0x3b1   :  { %2409 = vmatmul.mubr.msk.bf16.gmra.mrb[52].mxu1 %vm232_vm0, %v3146_v39  ;;  %v2644_v39 = vld [vmem:[#allocation15 + $0xb4] ss:$8 sps:$4 sm:$0xff]  }
 0x3b2   :  { %1385 = vmatprep.mubr.bf16.mxu1 %v2882_v2  ;;  %1741 = vmatprep.subr.bf16.mxu0 %v2644_v39 }
 0x3b9   :  { %2410 = vmatmul.mubr.msk.bf16.gmra.mrb[56].mxu1 %vm232_vm0, %v3151_v44  ;;  %v2642_v44 = vld [vmem:[#allocation15 + $0xb0] ss:$8 sps:$4 sm:$0xff]  }
 0x3ba   :  { %1395 = vmatprep.mubr.bf16.mxu1 %v2882_v2  ;;  %1742 = vmatpush1.bf16.msra.mxu0 %v2642_v44 }
 0x3bb   :  { %2439 = vmatprep.subr.msk.bf16.mxu0 %vm668_vm1, %v2438_v20 }
 0x3c1   :  { %2411 = vmatmul.mubr.msk.bf16.gmra.mrb[60].mxu1 %vm232_vm0, %v3156_v47  ;;  %v2437_v47 = vcombine.low %v1552_v19, %v1552_v19 }
 0x3c2   :  { %1405 = vmatprep.mubr.bf16.mxu1 %v2882_v2 }
 0x3c3   :  { %v1714_v21 = vsel %vm668_vm1, %v2437_v47, 0 }
 0x3c4   :  { %1744 = vmatpush1.bf16.msra.mxu0 %v1714_v21 }
 0x3c5   :  { %2509 = vmatprep.subr.bf16.mxu0 %v2883_v3 }
 0x3c9   :  { %2412 = vmatmul.mubr.msk.bf16.gmra.mrb[64].mxu1 %vm232_vm0, %v3161_v50  ;;  %v2647_v50 = vld [vmem:[#allocation16] sm:$0xff]  }
 0x3ca   :  { %2078 = vmatpush1.bf16.msra.mxu1 %v2647_v50 }
 0x3cb   :  { %2079 = vmatprep.subr.bf16.mxu1 %v2882_v2 }
 0x3ce   :  { %2080 = vmatpush1.bf16.msra.mxu1 %v2648_v22 }
 0x3cf   :  { %2081 = vmatprep.subr.bf16.mxu1 %v2882_v2 }
 0x3d2   :  { %2082 = vmatpush1.bf16.msra.mxu1 %v2649_v23 }
 0x3d3   :  { %2083 = vmatprep.subr.bf16.mxu1 %v2882_v2 }
 0x3d6   :  { %2084 = vmatpush1.bf16.msra.mxu1 %v2650_v24 }
 0x3d7   :  { %2085 = vmatprep.subr.bf16.mxu1 %v2882_v2 }
 0x3da   :  { %2086 = vmatpush1.bf16.msra.mxu1 %v2651_v26 }
 0x3db   :  { %2087 = vmatprep.subr.bf16.mxu1 %v2882_v2 }
 0x3de   :  { %2088 = vmatpush1.bf16.msra.mxu1 %v2652_v27 }
 0x3df   :  { %2089 = vmatprep.subr.bf16.mxu1 %v2882_v2 }
 0x3e2   :  { %2090 = vmatpush1.bf16.msra.mxu1 %v2653_v28 }
 0x3e3   :  { %2091 = vmatprep.subr.bf16.mxu1 %v2882_v2 }
 0x3e6   :  { %2092 = vmatpush1.bf16.msra.mxu1 %v2654_v29 }
 0x3e7   :  { %2093 = vmatprep.subr.bf16.mxu1 %v2882_v2 }
 0x3ea   :  { %2094 = vmatpush1.bf16.msra.mxu1 %v2655_v30 }
 0x3eb   :  { %2095 = vmatprep.subr.bf16.mxu1 %v2882_v2 }
 0x3ee   :  { %2096 = vmatpush1.bf16.msra.mxu1 %v2656_v31 }
 0x3ef   :  { %2097 = vmatprep.subr.bf16.mxu1 %v2882_v2 }
 0x3f2   :  { %2098 = vmatpush1.bf16.msra.mxu1 %v2657_v33 }
 0x3f3   :  { %2099 = vmatprep.subr.bf16.mxu1 %v2882_v2 }
 0x45c   :  { %v3370_v34 = vpop.f32.mrb[32].mxu1 }
 0x45d   :  { %v2507_v35 = vpop.f32.mrb[33].mxu1 }
 0x45e   :  { %v1262_v36 = vpop.f32.mrb[34].mxu1 }
 0x45f   :  { %v2508_v38 = vpop.f32.mrb[35].mxu1 }
 0x464   :  { %v1337_v42 = vpop.f32.mrb[36].mxu1 }
 0x465   :  { %v1338_v43 = vadd.f32 %v1337_v42, %v3376_v40  ;;  %v1339_v45 = vpop.f32.mrb[37].mxu1 }
 0x466   :  { %v1340_v46 = vadd.f32 %v1339_v45, %v3379_v41  ;;  %v1341_v48 = vpop.f32.mrb[38].mxu1 }
 0x467   :  { %v1448_v49 = vmul.f32 0.01, %v1338_v43  ;;  %v1342_v51 = vadd.f32 %v1341_v48, %v3376_v40  ;;  %v1343_v52 = vpop.f32.mrb[39].mxu1  ;;  %vm1416_vm0 = vcmp.gt.f32.partialorder %v1338_v43, 0.0 }
 0x468   :  { %v1449_v53 = vmul.f32 0.01, %v1340_v46  ;;  %v1344_v54 = vadd.f32 %v1343_v52, %v3379_v41  ;;  %vm1417_vm9 = vcmp.gt.f32.partialorder %v1340_v46, 0.0 }
 0x469   :  { %vm1418_vm10 = vcmp.gt.f32.partialorder %v1342_v51, 0.0  ;;  %v1450_v55 = vmul.f32 0.01, %v1342_v51  ;;  %v1480_v57 = vsel %vm1416_vm0, %v1338_v43, %v1448_v49 }
 0x46a   :  { %vm1419_vm11 = vcmp.gt.f32.partialorder %v1344_v54, 0.0  ;;  %v1451_v56 = vmul.f32 0.01, %v1344_v54  ;;  %v1481_v59 = vsel %vm1417_vm9, %v1340_v46, %v1449_v53 }
 0x46b   :  { %v1482_v58 = vsel %vm1418_vm10, %v1342_v51, %v1450_v55 }
 0x46c   :  { %v1512_v60 = vpack.c.bf16 %v1482_v58, %v1480_v57  ;;  %v1483_v61 = vsel %vm1419_vm11, %v1344_v54, %v1451_v56  ;;  %v1347_v62 = vpop.f32.mrb[40].mxu1 }
 0x46d   :  { %v1513_v63 = vpack.c.bf16 %v1483_v61, %v1481_v59  ;;  %v1348_v13 = vadd.f32 %v1347_v62, %v3376_v40  ;;  %v1349_v14 = vpop.f32.mrb[41].mxu1 }
 0x46e   :  { %v1350_v0 = vadd.f32 %v1349_v14, %v3379_v41  ;;  %v1351_v1 = vpop.f32.mrb[42].mxu1 }
 0x46f   :  { %v1452_v5 = vmul.f32 0.01, %v1348_v13  ;;  %v1352_v6 = vadd.f32 %v1351_v1, %v3376_v40  ;;  %v1353_v7 = vpop.f32.mrb[43].mxu1  ;;  %2440 = vmatprep.mubr.msk.bf16.mxu0 %vm643_vm6, %v1513_v63  ;;  %vm1420_vm12 = vcmp.gt.f32.partialorder %v1348_v13, 0.0 }
 0x470   :  { %v1453_v8 = vmul.f32 0.01, %v1350_v0  ;;  %v1354_v11 = vadd.f32 %v1353_v7, %v3379_v41  ;;  %1752 = vmatmul.mubr.bf16.vlgmr.msra.gmra.mrb[64].mxu0 %v1512_v60  ;;  %vm1421_vm13 = vcmp.gt.f32.partialorder %v1350_v0, 0.0 }
 0x471   :  { %vm1422_vm14 = vcmp.gt.f32.partialorder %v1352_v6, 0.0  ;;  %v1454_v15 = vmul.f32 0.01, %v1352_v6  ;;  %v1484_v16 = vsel %vm1420_vm12, %v1348_v13, %v1452_v5 }
 0x472   :  { %vm1423_vm2 = vcmp.gt.f32.partialorder %v1354_v11, 0.0  ;;  %v1455_v4 = vmul.f32 0.01, %v1354_v11  ;;  %v1485_v9 = vsel %vm1421_vm13, %v1350_v0, %v1453_v8 }
 0x473   :  { %v1486_v18 = vsel %vm1422_vm14, %v1352_v6, %v1454_v15 }
 0x474   :  { %v1487_v17 = vsel %vm1423_vm2, %v1354_v11, %v1455_v4  ;;  %v1357_v25 = vpop.f32.mrb[44].mxu1  ;;  %v1514_v32 = vpack.c.bf16 %v1486_v18, %v1484_v16 }
 0x475   :  { %v1515_v39 = vpack.c.bf16 %v1487_v17, %v1485_v9  ;;  %v1358_v44 = vadd.f32 %v1357_v25, %v3376_v40  ;;  %v1359_v19 = vpop.f32.mrb[45].mxu1 }
 0x476   :  { %v1360_v20 = vadd.f32 %v1359_v19, %v3379_v41  ;;  %v1361_v47 = vpop.f32.mrb[46].mxu1 }
 0x477   :  { %v1456_v21 = vmul.f32 0.01, %v1358_v44  ;;  %v1362_v50 = vadd.f32 %v1361_v47, %v3376_v40  ;;  %v1363_v22 = vpop.f32.mrb[47].mxu1  ;;  %2441 = vmatprep.mubr.msk.bf16.mxu0 %vm643_vm6, %v1515_v39  ;;  %vm1424_vm3 = vcmp.gt.f32.partialorder %v1358_v44, 0.0 }
 0x478   :  { %v1457_v23 = vmul.f32 0.01, %v1360_v20  ;;  %v1364_v24 = vadd.f32 %v1363_v22, %v3379_v41  ;;  %1762 = vmatmul.mubr.bf16.gmra.mrb[68].mxu0 %v1514_v32  ;;  %vm1425_vm5 = vcmp.gt.f32.partialorder %v1360_v20, 0.0 }
 0x479   :  { %vm1426_vm7 = vcmp.gt.f32.partialorder %v1362_v50, 0.0  ;;  %v1458_v26 = vmul.f32 0.01, %v1362_v50  ;;  %v1488_v28 = vsel %vm1424_vm3, %v1358_v44, %v1456_v21 }
 0x47a   :  { %vm1427_vm8 = vcmp.gt.f32.partialorder %v1364_v24, 0.0  ;;  %v1459_v27 = vmul.f32 0.01, %v1364_v24  ;;  %v1489_v30 = vsel %vm1425_vm5, %v1360_v20, %v1457_v23 }
 0x47b   :  { %v1490_v29 = vsel %vm1426_vm7, %v1362_v50, %v1458_v26 }
 0x47c   :  { %v1491_v31 = vsel %vm1427_vm8, %v1364_v24, %v1459_v27  ;;  %v1367_v33 = vpop.f32.mrb[48].mxu1  ;;  %v1516_v35 = vpack.c.bf16 %v1490_v29, %v1488_v28 }
 0x47d   :  { %v1517_v36 = vpack.c.bf16 %v1491_v31, %v1489_v30  ;;  %v1368_v37 = vadd.f32 %v1367_v33, %v3376_v40  ;;  %v1369_v38 = vpop.f32.mrb[49].mxu1 }
 0x47e   :  { %v1370_v42 = vadd.f32 %v1369_v38, %v3379_v41  ;;  %v1371_v43 = vpop.f32.mrb[50].mxu1 }
 0x47f   :  { %v1460_v45 = vmul.f32 0.01, %v1368_v37  ;;  %v1372_v46 = vadd.f32 %v1371_v43, %v3376_v40  ;;  %v1373_v48 = vpop.f32.mrb[51].mxu1  ;;  %2442 = vmatprep.mubr.msk.bf16.mxu0 %vm643_vm6, %v1517_v36  ;;  %vm1428_vm0 = vcmp.gt.f32.partialorder %v1368_v37, 0.0 }
 0x480   :  { %v1461_v49 = vmul.f32 0.01, %v1370_v42  ;;  %v1374_v51 = vadd.f32 %v1373_v48, %v3379_v41  ;;  %1772 = vmatmul.mubr.bf16.gmra.mrb[72].mxu0 %v1516_v35  ;;  %vm1429_vm9 = vcmp.gt.f32.partialorder %v1370_v42, 0.0 }
 0x481   :  { %vm1430_vm10 = vcmp.gt.f32.partialorder %v1372_v46, 0.0  ;;  %v1462_v52 = vmul.f32 0.01, %v1372_v46  ;;  %v1492_v54 = vsel %vm1428_vm0, %v1368_v37, %v1460_v45 }
 0x482   :  { %vm1431_vm11 = vcmp.gt.f32.partialorder %v1374_v51, 0.0  ;;  %v1463_v53 = vmul.f32 0.01, %v1374_v51  ;;  %v1493_v56 = vsel %vm1429_vm9, %v1370_v42, %v1461_v49 }
 0x483   :  { %v1494_v55 = vsel %vm1430_vm10, %v1372_v46, %v1462_v52 }
 0x484   :  { %v1495_v57 = vsel %vm1431_vm11, %v1374_v51, %v1463_v53  ;;  %v1377_v58 = vpop.f32.mrb[52].mxu1  ;;  %v1518_v59 = vpack.c.bf16 %v1494_v55, %v1492_v54 }
 0x485   :  { %v1519_v60 = vpack.c.bf16 %v1495_v57, %v1493_v56  ;;  %v1378_v61 = vadd.f32 %v1377_v58, %v3376_v40  ;;  %v1379_v62 = vpop.f32.mrb[53].mxu1 }
 0x486   :  { %v1380_v63 = vadd.f32 %v1379_v62, %v3379_v41  ;;  %v1381_v13 = vpop.f32.mrb[54].mxu1 }
 0x487   :  { %v1464_v14 = vmul.f32 0.01, %v1378_v61  ;;  %v1382_v0 = vadd.f32 %v1381_v13, %v3376_v40  ;;  %v1383_v1 = vpop.f32.mrb[55].mxu1  ;;  %2443 = vmatprep.mubr.msk.bf16.mxu0 %vm643_vm6, %v1519_v60  ;;  %vm1432_vm12 = vcmp.gt.f32.partialorder %v1378_v61, 0.0 }
 0x488   :  { %v1465_v5 = vmul.f32 0.01, %v1380_v63  ;;  %v1384_v6 = vadd.f32 %v1383_v1, %v3379_v41  ;;  %1782 = vmatmul.mubr.bf16.gmra.mrb[76].mxu0 %v1518_v59  ;;  %vm1433_vm13 = vcmp.gt.f32.partialorder %v1380_v63, 0.0 }
 0x489   :  { %vm1434_vm14 = vcmp.gt.f32.partialorder %v1382_v0, 0.0  ;;  %v1466_v7 = vmul.f32 0.01, %v1382_v0  ;;  %v1496_v11 = vsel %vm1432_vm12, %v1378_v61, %v1464_v14 }
 0x48a   :  { %vm1435_vm2 = vcmp.gt.f32.partialorder %v1384_v6, 0.0  ;;  %v1467_v8 = vmul.f32 0.01, %v1384_v6  ;;  %v1497_v4 = vsel %vm1433_vm13, %v1380_v63, %v1465_v5 }
 0x48b   :  { %v1498_v15 = vsel %vm1434_vm14, %v1382_v0, %v1466_v7 }
 0x48c   :  { %v1499_v16 = vsel %vm1435_vm2, %v1384_v6, %v1467_v8  ;;  %v1387_v18 = vpop.f32.mrb[56].mxu1  ;;  %v1520_v9 = vpack.c.bf16 %v1498_v15, %v1496_v11 }
 0x48d   :  { %v1521_v17 = vpack.c.bf16 %v1499_v16, %v1497_v4  ;;  %v1388_v25 = vadd.f32 %v1387_v18, %v3376_v40  ;;  %v1389_v32 = vpop.f32.mrb[57].mxu1  ;;  %v1266_v18 = vld [vmem:[%s3545_s13] sm:$0x3] }
 0x48e   :  { %v1390_v39 = vadd.f32 %v1389_v32, %v3379_v41  ;;  %v1391_v44 = vpop.f32.mrb[58].mxu1 }
 0x48f   :  { %v1468_v19 = vmul.f32 0.01, %v1388_v25  ;;  %v1392_v20 = vadd.f32 %v1391_v44, %v3376_v40  ;;  %v1393_v47 = vpop.f32.mrb[59].mxu1  ;;  %2444 = vmatprep.mubr.msk.bf16.mxu0 %vm643_vm6, %v1521_v17  ;;  %vm1436_vm3 = vcmp.gt.f32.partialorder %v1388_v25, 0.0  ;;  %v3432_v17 = vrot.slane %v1266_v18, %v3183_v12 }
 0x490   :  { %v1469_v21 = vmul.f32 0.01, %v1390_v39  ;;  %v1394_v50 = vadd.f32 %v1393_v47, %v3379_v41  ;;  %1792 = vmatmul.mubr.bf16.gmra.mrb[80].mxu0 %v1520_v9  ;;  %vm1437_vm5 = vcmp.gt.f32.partialorder %v1390_v39, 0.0  ;;  %v3429_v9 = vrot.slane %v1266_v18, %v3178_v10 }
 0x491   :  { %vm1438_vm7 = vcmp.gt.f32.partialorder %v1392_v20, 0.0  ;;  %v1470_v22 = vmul.f32 0.01, %v1392_v20  ;;  %v1500_v24 = vsel %vm1436_vm3, %v1388_v25, %v1468_v19 }
 0x492   :  { %vm1439_vm8 = vcmp.gt.f32.partialorder %v1394_v50, 0.0  ;;  %v1471_v23 = vmul.f32 0.01, %v1394_v50  ;;  %v1501_v27 = vsel %vm1437_vm5, %v1390_v39, %v1469_v21 }
 0x493   :  { %v1502_v26 = vsel %vm1438_vm7, %v1392_v20, %v1470_v22 }
 0x494   :  { %v1503_v28 = vsel %vm1439_vm8, %v1394_v50, %v1471_v23  ;;  %v1397_v29 = vpop.f32.mrb[60].mxu1  ;;  %v1522_v30 = vpack.c.bf16 %v1502_v26, %v1500_v24 }
 0x495   :  { %v1523_v31 = vpack.c.bf16 %v1503_v28, %v1501_v27  ;;  %v1398_v33 = vadd.f32 %v1397_v29, %v3376_v40  ;;  %v1399_v35 = vpop.f32.mrb[61].mxu1 }
 0x496   :  { %v1400_v36 = vadd.f32 %v1399_v35, %v3379_v41  ;;  %v1401_v37 = vpop.f32.mrb[62].mxu1 }
 0x497   :  { %v1472_v38 = vmul.f32 0.01, %v1398_v33  ;;  %v1402_v42 = vadd.f32 %v1401_v37, %v3376_v40  ;;  %v1403_v43 = vpop.f32.mrb[63].mxu1  ;;  %2445 = vmatprep.mubr.msk.bf16.mxu0 %vm643_vm6, %v1523_v31  ;;  %vm1440_vm0 = vcmp.gt.f32.partialorder %v1398_v33, 0.0 }
 0x498   :  { %v1473_v45 = vmul.f32 0.01, %v1400_v36  ;;  %v1404_v46 = vadd.f32 %v1403_v43, %v3379_v41  ;;  %1802 = vmatmul.mubr.bf16.gmra.mrb[84].mxu0 %v1522_v30  ;;  %vm1441_vm9 = vcmp.gt.f32.partialorder %v1400_v36, 0.0 }
 0x499   :  { %vm1442_vm10 = vcmp.gt.f32.partialorder %v1402_v42, 0.0  ;;  %v1474_v48 = vmul.f32 0.01, %v1402_v42  ;;  %v1504_v51 = vsel %vm1440_vm0, %v1398_v33, %v1472_v38 }
 0x49a   :  { %vm1443_vm11 = vcmp.gt.f32.partialorder %v1404_v46, 0.0  ;;  %v1475_v49 = vmul.f32 0.01, %v1404_v46  ;;  %v1505_v53 = vsel %vm1441_vm9, %v1400_v36, %v1473_v45 }
 0x49b   :  { %v1506_v52 = vsel %vm1442_vm10, %v1402_v42, %v1474_v48 }
 0x49c   :  { %v1507_v54 = vsel %vm1443_vm11, %v1404_v46, %v1475_v49  ;;  %v1407_v55 = vpop.f32.mrb[64].mxu1  ;;  %v1524_v56 = vpack.c.bf16 %v1506_v52, %v1504_v51 }
 0x49d   :  { %v1525_v57 = vpack.c.bf16 %v1507_v54, %v1505_v53  ;;  %v1408_v58 = vadd.f32 %v1407_v55, %v3376_v40  ;;  %v1409_v59 = vpop.f32.mrb[65].mxu1 }
 0x49e   :  { %v1410_v60 = vadd.f32 %v1409_v59, %v3379_v41  ;;  %v1411_v61 = vpop.f32.mrb[66].mxu1 }
 0x49f   :  { %v1476_v62 = vmul.f32 0.01, %v1408_v58  ;;  %v1412_v63 = vadd.f32 %v1411_v61, %v3376_v40  ;;  %v1413_v13 = vpop.f32.mrb[67].mxu1  ;;  %2446 = vmatprep.mubr.msk.bf16.mxu0 %vm643_vm6, %v1525_v57  ;;  %vm1444_vm12 = vcmp.gt.f32.partialorder %v1408_v58, 0.0  ;;  %v2658_v40 = vld [vmem:[#allocation16 + $0x58] sm:$0xff]  }
 0x4a0   :  { %v1477_v14 = vmul.f32 0.01, %v1410_v60  ;;  %v1414_v0 = vadd.f32 %v1413_v13, %v3379_v41  ;;  %1812 = vmatmul.mubr.bf16.gmra.mrb[88].mxu0 %v1524_v56  ;;  %vm1445_vm13 = vcmp.gt.f32.partialorder %v1410_v60, 0.0  ;;  %2100 = vmatpush1.bf16.msra.mxu1 %v2658_v40  ;;  %v2659_v41 = vld [vmem:[#allocation16 + $0x60] ss:$0 sps:$4 sm:$0xff]  }
 0x4a1   :  { %vm1446_vm14 = vcmp.gt.f32.partialorder %v1412_v63, 0.0  ;;  %v1478_v1 = vmul.f32 0.01, %v1412_v63  ;;  %v1508_v6 = vsel %vm1444_vm12, %v1408_v58, %v1476_v62  ;;  %2101 = vmatprep.subr.bf16.mxu1 %v2882_v2  ;;  %v2075_v16 = vsel %vm668_vm1, %v2659_v41, 0 }
 0x4a2   :  { %vm1447_vm2 = vcmp.gt.f32.partialorder %v1414_v0, 0.0  ;;  %v1479_v5 = vmul.f32 0.01, %v1414_v0  ;;  %v1509_v8 = vsel %vm1445_vm13, %v1410_v60, %v1477_v14 }
 0x4a3   :  { %v1510_v7 = vsel %vm1446_vm14, %v1412_v63, %v1478_v1 }
 0x4a4   :  { %v1511_v11 = vsel %vm1447_vm2, %v1414_v0, %v1479_v5  ;;  %v1526_v15 = vpack.c.bf16 %v1510_v7, %v1508_v6  ;;  %2102 = vmatpush1.bf16.msra.mxu1 %v2075_v16 }
 0x4a5   :  { %v1527_v4 = vpack.c.bf16 %v1511_v11, %v1509_v8 }
 0x4a7   :  { %2447 = vmatprep.mubr.msk.bf16.mxu0 %vm643_vm6, %v1527_v4 }
 0x4a8   :  { %1822 = vmatmul.mubr.bf16.gmra.mrb[92].mxu0 %v1526_v15 }
 0x4a9   :  { %2525 = vmatprep.mubr.msk.bf16.mxu0 %vm2884_vm15, %v2883_v3 }
 0x543   :  { %v1753_v25 = vpop.f32.mrb[64].mxu0 }
 0x544   :  { %v1754_v32 = vadd.f32 %v1753_v25, %v3429_v9  ;;  %v1755_v39 = vpop.f32.mrb[65].mxu0 }
 0x545   :  { %v1756_v2 = vadd.f32 %v1755_v39, %v3432_v17  ;;  %v1757_v44 = vpop.f32.mrb[66].mxu0 }
 0x546   :  { %v1864_v19 = vmul.f32 0.01, %v1754_v32  ;;  %v1758_v20 = vadd.f32 %v1757_v44, %v3429_v9  ;;  %v1759_v47 = vpop.f32.mrb[67].mxu0  ;;  %vm1832_vm1 = vcmp.gt.f32.partialorder %v1754_v32, 0.0 }
 0x547   :  { %v1865_v21 = vmul.f32 0.01, %v1756_v2  ;;  %v1760_v50 = vadd.f32 %v1759_v47, %v3432_v17  ;;  %vm1833_vm15 = vcmp.gt.f32.partialorder %v1756_v2, 0.0 }
 0x548   :  { %vm1834_vm3 = vcmp.gt.f32.partialorder %v1758_v20, 0.0  ;;  %v1866_v22 = vmul.f32 0.01, %v1758_v20  ;;  %v1896_v23 = vsel %vm1832_vm1, %v1754_v32, %v1864_v19 }
 0x549   :  { %vm1835_vm5 = vcmp.gt.f32.partialorder %v1760_v50, 0.0  ;;  %v1867_v12 = vmul.f32 0.01, %v1760_v50  ;;  %v1897_v26 = vsel %vm1833_vm15, %v1756_v2, %v1865_v21 }
 0x54a   :  { %v1898_v24 = vsel %vm1834_vm3, %v1758_v20, %v1866_v22 }
 0x54b   :  { %v1928_v27 = vpack.c.bf16 %v1898_v24, %v1896_v23  ;;  %v1899_v28 = vsel %vm1835_vm5, %v1760_v50, %v1867_v12  ;;  %v1763_v29 = vpop.f32.mrb[68].mxu0 }
 0x54c   :  { %v1929_v30 = vpack.c.bf16 %v1899_v28, %v1897_v26  ;;  %v1764_v31 = vadd.f32 %v1763_v29, %v3429_v9  ;;  %v1765_v33 = vpop.f32.mrb[69].mxu0 }
 0x54d   :  { %v1766_v35 = vadd.f32 %v1765_v33, %v3432_v17  ;;  %v1767_v36 = vpop.f32.mrb[70].mxu0 }
 0x54e   :  { %v1868_v37 = vmul.f32 0.01, %v1764_v31  ;;  %v1768_v38 = vadd.f32 %v1767_v36, %v3429_v9  ;;  %v1769_v42 = vpop.f32.mrb[71].mxu0  ;;  %2462 = vmatprep.mubr.msk.bf16.mxu1 %vm643_vm6, %v1929_v30  ;;  %vm1836_vm7 = vcmp.gt.f32.partialorder %v1764_v31, 0.0 }
 0x54f   :  { %v1869_v43 = vmul.f32 0.01, %v1766_v35  ;;  %v1770_v45 = vadd.f32 %v1769_v42, %v3432_v17  ;;  %2110 = vmatmul.mubr.bf16.vlgmr.msra.gmra.mrb[68].mxu1 %v1928_v27  ;;  %vm1837_vm8 = vcmp.gt.f32.partialorder %v1766_v35, 0.0 }
 0x550   :  { %vm1838_vm0 = vcmp.gt.f32.partialorder %v1768_v38, 0.0  ;;  %v1870_v46 = vmul.f32 0.01, %v1768_v38  ;;  %v1900_v49 = vsel %vm1836_vm7, %v1764_v31, %v1868_v37 }
 0x551   :  { %vm1839_vm9 = vcmp.gt.f32.partialorder %v1770_v45, 0.0  ;;  %v1871_v48 = vmul.f32 0.01, %v1770_v45  ;;  %v1901_v52 = vsel %vm1837_vm8, %v1766_v35, %v1869_v43 }
 0x552   :  { %v1902_v51 = vsel %vm1838_vm0, %v1768_v38, %v1870_v46 }
 0x553   :  { %v1903_v53 = vsel %vm1839_vm9, %v1770_v45, %v1871_v48  ;;  %v1773_v54 = vpop.f32.mrb[72].mxu0  ;;  %v1930_v55 = vpack.c.bf16 %v1902_v51, %v1900_v49 }
 0x554   :  { %v1931_v56 = vpack.c.bf16 %v1903_v53, %v1901_v52  ;;  %v1774_v57 = vadd.f32 %v1773_v54, %v3429_v9  ;;  %v1775_v58 = vpop.f32.mrb[73].mxu0 }
 0x555   :  { %v1776_v59 = vadd.f32 %v1775_v58, %v3432_v17  ;;  %v1777_v60 = vpop.f32.mrb[74].mxu0 }
 0x556   :  { %v1872_v61 = vmul.f32 0.01, %v1774_v57  ;;  %v1778_v62 = vadd.f32 %v1777_v60, %v3429_v9  ;;  %v1779_v63 = vpop.f32.mrb[75].mxu0  ;;  %2463 = vmatprep.mubr.msk.bf16.mxu1 %vm643_vm6, %v1931_v56  ;;  %vm1840_vm10 = vcmp.gt.f32.partialorder %v1774_v57, 0.0 }
 0x557   :  { %v1873_v13 = vmul.f32 0.01, %v1776_v59  ;;  %v1780_v14 = vadd.f32 %v1779_v63, %v3432_v17  ;;  %2118 = vmatmul.mubr.bf16.gmra.mrb[72].mxu1 %v1930_v55  ;;  %vm1841_vm11 = vcmp.gt.f32.partialorder %v1776_v59, 0.0 }
 0x558   :  { %vm1842_vm12 = vcmp.gt.f32.partialorder %v1778_v62, 0.0  ;;  %v1874_v0 = vmul.f32 0.01, %v1778_v62  ;;  %v1904_v5 = vsel %vm1840_vm10, %v1774_v57, %v1872_v61 }
 0x559   :  { %vm1843_vm13 = vcmp.gt.f32.partialorder %v1780_v14, 0.0  ;;  %v1875_v1 = vmul.f32 0.01, %v1780_v14  ;;  %v1905_v7 = vsel %vm1841_vm11, %v1776_v59, %v1873_v13 }
 0x55a   :  { %v1906_v6 = vsel %vm1842_vm12, %v1778_v62, %v1874_v0 }
 0x55b   :  { %v1907_v8 = vsel %vm1843_vm13, %v1780_v14, %v1875_v1  ;;  %v1783_v11 = vpop.f32.mrb[76].mxu0  ;;  %v1932_v15 = vpack.c.bf16 %v1906_v6, %v1904_v5 }
 0x55c   :  { %v1933_v4 = vpack.c.bf16 %v1907_v8, %v1905_v7  ;;  %v1784_v40 = vadd.f32 %v1783_v11, %v3429_v9  ;;  %v1785_v41 = vpop.f32.mrb[77].mxu0 }
 0x55d   :  { %v1786_v16 = vadd.f32 %v1785_v41, %v3432_v17  ;;  %v1787_v18 = vpop.f32.mrb[78].mxu0 }
 0x55e   :  { %v1876_v25 = vmul.f32 0.01, %v1784_v40  ;;  %v1788_v32 = vadd.f32 %v1787_v18, %v3429_v9  ;;  %v1789_v39 = vpop.f32.mrb[79].mxu0  ;;  %2464 = vmatprep.mubr.msk.bf16.mxu1 %vm643_vm6, %v1933_v4  ;;  %vm1844_vm14 = vcmp.gt.f32.partialorder %v1784_v40, 0.0 }
 0x55f   :  { %v1877_v2 = vmul.f32 0.01, %v1786_v16  ;;  %v1790_v44 = vadd.f32 %v1789_v39, %v3432_v17  ;;  %2126 = vmatmul.mubr.bf16.gmra.mrb[76].mxu1 %v1932_v15  ;;  %vm1845_vm2 = vcmp.gt.f32.partialorder %v1786_v16, 0.0 }
 0x560   :  { %vm1846_vm1 = vcmp.gt.f32.partialorder %v1788_v32, 0.0  ;;  %v1878_v19 = vmul.f32 0.01, %v1788_v32  ;;  %v1908_v47 = vsel %vm1844_vm14, %v1784_v40, %v1876_v25 }
 0x561   :  { %vm1847_vm15 = vcmp.gt.f32.partialorder %v1790_v44, 0.0  ;;  %v1879_v20 = vmul.f32 0.01, %v1790_v44  ;;  %v1909_v50 = vsel %vm1845_vm2, %v1786_v16, %v1877_v2 }
 0x562   :  { %v1910_v21 = vsel %vm1846_vm1, %v1788_v32, %v1878_v19 }
 0x563   :  { %v1911_v22 = vsel %vm1847_vm15, %v1790_v44, %v1879_v20  ;;  %v1793_v12 = vpop.f32.mrb[80].mxu0  ;;  %v1934_v23 = vpack.c.bf16 %v1910_v21, %v1908_v47 }
 0x564   :  { %v1935_v24 = vpack.c.bf16 %v1911_v22, %v1909_v50  ;;  %v1794_v26 = vadd.f32 %v1793_v12, %v3429_v9  ;;  %v1795_v27 = vpop.f32.mrb[81].mxu0 }
 0x565   :  { %v1796_v28 = vadd.f32 %v1795_v27, %v3432_v17  ;;  %v1797_v29 = vpop.f32.mrb[82].mxu0 }
 0x566   :  { %v1880_v30 = vmul.f32 0.01, %v1794_v26  ;;  %v1798_v31 = vadd.f32 %v1797_v29, %v3429_v9  ;;  %v1799_v33 = vpop.f32.mrb[83].mxu0  ;;  %2465 = vmatprep.mubr.msk.bf16.mxu1 %vm643_vm6, %v1935_v24  ;;  %vm1848_vm3 = vcmp.gt.f32.partialorder %v1794_v26, 0.0 }
 0x567   :  { %v1881_v35 = vmul.f32 0.01, %v1796_v28  ;;  %v1800_v36 = vadd.f32 %v1799_v33, %v3432_v17  ;;  %2134 = vmatmul.mubr.bf16.gmra.mrb[80].mxu1 %v1934_v23  ;;  %vm1849_vm5 = vcmp.gt.f32.partialorder %v1796_v28, 0.0 }
 0x568   :  { %vm1850_vm7 = vcmp.gt.f32.partialorder %v1798_v31, 0.0  ;;  %v1882_v37 = vmul.f32 0.01, %v1798_v31  ;;  %v1912_v42 = vsel %vm1848_vm3, %v1794_v26, %v1880_v30 }
 0x569   :  { %vm1851_vm8 = vcmp.gt.f32.partialorder %v1800_v36, 0.0  ;;  %v1883_v38 = vmul.f32 0.01, %v1800_v36  ;;  %v1913_v45 = vsel %vm1849_vm5, %v1796_v28, %v1881_v35 }
 0x56a   :  { %v1914_v43 = vsel %vm1850_vm7, %v1798_v31, %v1882_v37 }
 0x56b   :  { %v1915_v46 = vsel %vm1851_vm8, %v1800_v36, %v1883_v38  ;;  %v1803_v48 = vpop.f32.mrb[84].mxu0  ;;  %v1936_v49 = vpack.c.bf16 %v1914_v43, %v1912_v42 }
 0x56c   :  { %v1937_v51 = vpack.c.bf16 %v1915_v46, %v1913_v45  ;;  %v1804_v52 = vadd.f32 %v1803_v48, %v3429_v9  ;;  %v1805_v53 = vpop.f32.mrb[85].mxu0 }
 0x56d   :  { %v1806_v54 = vadd.f32 %v1805_v53, %v3432_v17  ;;  %v1807_v55 = vpop.f32.mrb[86].mxu0 }
 0x56e   :  { %v1884_v56 = vmul.f32 0.01, %v1804_v52  ;;  %v1808_v57 = vadd.f32 %v1807_v55, %v3429_v9  ;;  %v1809_v58 = vpop.f32.mrb[87].mxu0  ;;  %2466 = vmatprep.mubr.msk.bf16.mxu1 %vm643_vm6, %v1937_v51  ;;  %vm1852_vm0 = vcmp.gt.f32.partialorder %v1804_v52, 0.0 }
 0x56f   :  { %v1885_v59 = vmul.f32 0.01, %v1806_v54  ;;  %v1810_v60 = vadd.f32 %v1809_v58, %v3432_v17  ;;  %2142 = vmatmul.mubr.bf16.gmra.mrb[84].mxu1 %v1936_v49  ;;  %vm1853_vm9 = vcmp.gt.f32.partialorder %v1806_v54, 0.0 }
 0x570   :  { %vm1854_vm10 = vcmp.gt.f32.partialorder %v1808_v57, 0.0  ;;  %v1886_v61 = vmul.f32 0.01, %v1808_v57  ;;  %v1916_v63 = vsel %vm1852_vm0, %v1804_v52, %v1884_v56 }
 0x571   :  { %vm1855_vm11 = vcmp.gt.f32.partialorder %v1810_v60, 0.0  ;;  %v1887_v62 = vmul.f32 0.01, %v1810_v60  ;;  %v1917_v14 = vsel %vm1853_vm9, %v1806_v54, %v1885_v59 }
 0x572   :  { %v1918_v13 = vsel %vm1854_vm10, %v1808_v57, %v1886_v61 }
 0x573   :  { %v1919_v0 = vsel %vm1855_vm11, %v1810_v60, %v1887_v62  ;;  %v1813_v1 = vpop.f32.mrb[88].mxu0  ;;  %v1938_v5 = vpack.c.bf16 %v1918_v13, %v1916_v63 }
 0x574   :  { %v1939_v6 = vpack.c.bf16 %v1919_v0, %v1917_v14  ;;  %v1814_v7 = vadd.f32 %v1813_v1, %v3429_v9  ;;  %v1815_v8 = vpop.f32.mrb[89].mxu0 }
 0x575   :  { %v1816_v11 = vadd.f32 %v1815_v8, %v3432_v17  ;;  %v1817_v15 = vpop.f32.mrb[90].mxu0 }
 0x576   :  { %v1888_v4 = vmul.f32 0.01, %v1814_v7  ;;  %v1818_v40 = vadd.f32 %v1817_v15, %v3429_v9  ;;  %v1819_v41 = vpop.f32.mrb[91].mxu0  ;;  %2467 = vmatprep.mubr.msk.bf16.mxu1 %vm643_vm6, %v1939_v6  ;;  %vm1856_vm12 = vcmp.gt.f32.partialorder %v1814_v7, 0.0 }
 0x577   :  { %v1889_v16 = vmul.f32 0.01, %v1816_v11  ;;  %v1820_v18 = vadd.f32 %v1819_v41, %v3432_v17  ;;  %2150 = vmatmul.mubr.bf16.gmra.mrb[88].mxu1 %v1938_v5  ;;  %vm1857_vm13 = vcmp.gt.f32.partialorder %v1816_v11, 0.0 }
 0x578   :  { %vm1858_vm14 = vcmp.gt.f32.partialorder %v1818_v40, 0.0  ;;  %v1890_v25 = vmul.f32 0.01, %v1818_v40  ;;  %v1920_v39 = vsel %vm1856_vm12, %v1814_v7, %v1888_v4 }
 0x579   :  { %vm1859_vm2 = vcmp.gt.f32.partialorder %v1820_v18, 0.0  ;;  %v1891_v32 = vmul.f32 0.01, %v1820_v18  ;;  %v1921_v44 = vsel %vm1857_vm13, %v1816_v11, %v1889_v16 }
 0x57a   :  { %v1922_v2 = vsel %vm1858_vm14, %v1818_v40, %v1890_v25 }
 0x57b   :  { %v1923_v19 = vsel %vm1859_vm2, %v1820_v18, %v1891_v32  ;;  %v1823_v20 = vpop.f32.mrb[92].mxu0  ;;  %v1940_v47 = vpack.c.bf16 %v1922_v2, %v1920_v39 }
 0x57c   :  { %v1941_v21 = vpack.c.bf16 %v1923_v19, %v1921_v44  ;;  %v1824_v50 = vadd.f32 %v1823_v20, %v3429_v9  ;;  %v1825_v22 = vpop.f32.mrb[93].mxu0 }
 0x57d   :  { %v1826_v12 = vadd.f32 %v1825_v22, %v3432_v17  ;;  %v1827_v23 = vpop.f32.mrb[94].mxu0 }
 0x57e   :  { %v1892_v24 = vmul.f32 0.01, %v1824_v50  ;;  %v1828_v26 = vadd.f32 %v1827_v23, %v3429_v9  ;;  %v1829_v27 = vpop.f32.mrb[95].mxu0  ;;  %2468 = vmatprep.mubr.msk.bf16.mxu1 %vm643_vm6, %v1941_v21  ;;  %vm1860_vm1 = vcmp.gt.f32.partialorder %v1824_v50, 0.0  ;;  %v2231_v9 = vld [vmem:[#allocation3] sm:$0x1] }
 0x57f   :  { %v1893_v28 = vmul.f32 0.01, %v1826_v12  ;;  %v1830_v29 = vadd.f32 %v1829_v27, %v3432_v17  ;;  %2158 = vmatmul.mubr.bf16.gmra.mrb[92].mxu1 %v1940_v47  ;;  %vm1861_vm15 = vcmp.gt.f32.partialorder %v1826_v12, 0.0  ;;  %2234 = vperm.xlu0 %2545, %v2231_v9   ;;  %v3477_v17 = vld [vmem:[%s3547_s15] ss:$0 sm:$0xff] }
 0x580   :  { %vm1862_vm3 = vcmp.gt.f32.partialorder %v1828_v26, 0.0  ;;  %v1894_v30 = vmul.f32 0.01, %v1828_v26  ;;  %v1924_v33 = vsel %vm1860_vm1, %v1824_v50, %v1892_v24 }
 0x581   :  { %vm1863_vm5 = vcmp.gt.f32.partialorder %v1830_v29, 0.0  ;;  %v1895_v31 = vmul.f32 0.01, %v1830_v29  ;;  %v1925_v36 = vsel %vm1861_vm15, %v1826_v12, %v1893_v28 }
 0x582   :  { %v1926_v35 = vsel %vm1862_vm3, %v1828_v26, %v1894_v30 }
 0x583   :  { %v1927_v37 = vsel %vm1863_vm5, %v1830_v29, %v1895_v31  ;;  %v1942_v38 = vpack.c.bf16 %v1926_v35, %v1924_v33 }
 0x584   :  { %v1943_v42 = vpack.c.bf16 %v1927_v37, %v1925_v36 }
 0x586   :  { %2469 = vmatprep.mubr.msk.bf16.mxu1 %vm643_vm6, %v1943_v42 }
 0x587   :  { %2166 = vmatmul.mubr.bf16.gmra.mrb[96].mxu1 %v1942_v38 }
 0x622   :  { %v2111_v43 = vpop.f32.mrb[68].mxu1 }
 0x623   :  { %v2112_v45 = vadd.f32 %v3477_v17, %v2111_v43  ;;  %v2113_v46 = vpop.f32.mrb[69].mxu1 }
 0x624   :  { %v2114_v48 = vpop.f32.mrb[70].mxu1 }
 0x625   :  { %v2190_v49 = vmul.f32 0.01, %v2112_v45  ;;  %v2115_v51 = vadd.f32 %v3477_v17, %v2114_v48  ;;  %v2116_v52 = vpop.f32.mrb[71].mxu1  ;;  %vm2174_vm7 = vcmp.gt.f32.partialorder %v2112_v45, 0.0 }
 0x627   :  { %vm2175_vm8 = vcmp.gt.f32.partialorder %v2115_v51, 0.0  ;;  %v2191_v53 = vmul.f32 0.01, %v2115_v51  ;;  %v2206_v54 = vsel %vm2174_vm7, %v2112_v45, %v2190_v49 }
 0x629   :  { %v2207_v55 = vsel %vm2175_vm8, %v2115_v51, %v2191_v53 }
 0x62a   :  { %v2119_v56 = vpop.f32.mrb[72].mxu1  ;;  %v2223_v57 = vpack.c.bf16 %v2207_v55, %v2206_v54 }
 0x62b   :  { %v2120_v58 = vadd.f32 %v3477_v17, %v2119_v56  ;;  %v2121_v59 = vpop.f32.mrb[73].mxu1 }
 0x62c   :  { %v2122_v60 = vpop.f32.mrb[74].mxu1  ;;  %v2245_v61 = vsel %vm1197_vm4, %v2223_v57, 0 }
 0x62d   :  { %v2192_v62 = vmul.f32 0.01, %v2120_v58  ;;  %v2123_v63 = vadd.f32 %v3477_v17, %v2122_v60  ;;  %v2124_v13 = vpop.f32.mrb[75].mxu1  ;;  %2510 = vmatpush3.bf16.xpose.msra.mxu0 %v2245_v61  ;;  %vm2176_vm6 = vcmp.gt.f32.partialorder %v2120_v58, 0.0 }
 0x62e   :  { %2511 = vmatprep.subr.bf16.mxu0 %v2883_v3 }
 0x62f   :  { %vm2177_vm0 = vcmp.gt.f32.partialorder %v2123_v63, 0.0  ;;  %v2193_v14 = vmul.f32 0.01, %v2123_v63  ;;  %v2208_v0 = vsel %vm2176_vm6, %v2120_v58, %v2192_v62 }
 0x631   :  { %v2209_v1 = vsel %vm2177_vm0, %v2123_v63, %v2193_v14 }
 0x632   :  { %v2127_v5 = vpop.f32.mrb[76].mxu1  ;;  %v2224_v6 = vpack.c.bf16 %v2209_v1, %v2208_v0 }
 0x633   :  { %v2128_v7 = vadd.f32 %v3477_v17, %v2127_v5  ;;  %v2129_v8 = vpop.f32.mrb[77].mxu1 }
 0x634   :  { %v2130_v11 = vpop.f32.mrb[78].mxu1  ;;  %v2248_v15 = vsel %vm1197_vm4, %v2224_v6, 0 }
 0x635   :  { %v2194_v4 = vmul.f32 0.01, %v2128_v7  ;;  %v2131_v40 = vadd.f32 %v3477_v17, %v2130_v11  ;;  %v2132_v41 = vpop.f32.mrb[79].mxu1  ;;  %2512 = vmatpush3.bf16.xpose.msra.mxu0 %v2248_v15  ;;  %vm2178_vm9 = vcmp.gt.f32.partialorder %v2128_v7, 0.0 }
 0x636   :  { %2513 = vmatprep.subr.bf16.mxu0 %v2883_v3 }
 0x637   :  { %vm2179_vm10 = vcmp.gt.f32.partialorder %v2131_v40, 0.0  ;;  %v2195_v16 = vmul.f32 0.01, %v2131_v40  ;;  %v2210_v18 = vsel %vm2178_vm9, %v2128_v7, %v2194_v4 }
 0x639   :  { %v2211_v25 = vsel %vm2179_vm10, %v2131_v40, %v2195_v16 }
 0x63a   :  { %v2135_v32 = vpop.f32.mrb[80].mxu1  ;;  %v2225_v39 = vpack.c.bf16 %v2211_v25, %v2210_v18 }
 0x63b   :  { %v2136_v2 = vadd.f32 %v3477_v17, %v2135_v32  ;;  %v2137_v44 = vpop.f32.mrb[81].mxu1 }
 0x63c   :  { %v2138_v19 = vpop.f32.mrb[82].mxu1  ;;  %v2251_v20 = vsel %vm1197_vm4, %v2225_v39, 0 }
 0x63d   :  { %v2196_v47 = vmul.f32 0.01, %v2136_v2  ;;  %v2139_v21 = vadd.f32 %v3477_v17, %v2138_v19  ;;  %v2140_v50 = vpop.f32.mrb[83].mxu1  ;;  %2514 = vmatpush3.bf16.xpose.msra.mxu0 %v2251_v20  ;;  %vm2180_vm11 = vcmp.gt.f32.partialorder %v2136_v2, 0.0 }
 0x63e   :  { %2515 = vmatprep.subr.bf16.mxu0 %v2883_v3 }
 0x63f   :  { %vm2181_vm12 = vcmp.gt.f32.partialorder %v2139_v21, 0.0  ;;  %v2197_v22 = vmul.f32 0.01, %v2139_v21  ;;  %v2212_v12 = vsel %vm2180_vm11, %v2136_v2, %v2196_v47  ;;  %v2222_v2 = vld [vmem:[%s3548_s16] sm:$0x1]  ;;  %s2836_s16 = scalar_lea.vmem %s2319_s20, 16 }
 0x640   :  { %p2837_p8 = scmp.ne.s32.totalorder %s2319_s20, %s2836_s16  ;;  %p2842_p10 = scmp.lt.s32.totalorder %s2840_s25, %s2836_s16 }
 0x641   :  { %v2213_v23 = vsel %vm2181_vm12, %v2139_v21, %v2197_v22 }
 0x642   :  { %v2143_v24 = vpop.f32.mrb[84].mxu1  ;;  %v2226_v26 = vpack.c.bf16 %v2213_v23, %v2212_v12  ;;  %p2843_p11 = por %p2842_p10, %p2841_p9 }
 0x643   :  { %v2144_v27 = vadd.f32 %v3477_v17, %v2143_v24  ;;  %v2145_v28 = vpop.f32.mrb[85].mxu1 }
 0x644   :  { %v2146_v29 = vpop.f32.mrb[86].mxu1  ;;  %v2254_v30 = vsel %vm1197_vm4, %v2226_v26, 0  ;;  %p2844_p12 = pnand %p2843_p11, %p2837_p8 }
 0x645   :  { %v2198_v31 = vmul.f32 0.01, %v2144_v27  ;;  %v2147_v33 = vadd.f32 %v3477_v17, %v2146_v29  ;;  %v2148_v35 = vpop.f32.mrb[87].mxu1  ;;  %2516 = vmatpush3.bf16.xpose.msra.mxu0 %v2254_v30  ;;  %vm2182_vm13 = vcmp.gt.f32.partialorder %v2144_v27, 0.0 }
 0x646   :  { %2517 = vmatprep.subr.bf16.mxu0 %v2883_v3 }
 0x647   :  { %vm2183_vm14 = vcmp.gt.f32.partialorder %v2147_v33, 0.0  ;;  %v2199_v36 = vmul.f32 0.01, %v2147_v33  ;;  %v2214_v37 = vsel %vm2182_vm13, %v2144_v27, %v2198_v31 }
 0x649   :  { %v2215_v38 = vsel %vm2183_vm14, %v2147_v33, %v2199_v36 }
 0x64a   :  { %v2151_v42 = vpop.f32.mrb[88].mxu1  ;;  %v2227_v9 = vpack.c.bf16 %v2215_v38, %v2214_v37 }
 0x64b   :  { %v2152_v43 = vadd.f32 %v3477_v17, %v2151_v42  ;;  %v2153_v45 = vpop.f32.mrb[89].mxu1 }
 0x64c   :  { %v2154_v46 = vpop.f32.mrb[90].mxu1  ;;  %v2257_v48 = vsel %vm1197_vm4, %v2227_v9, 0 }
 0x64d   :  { %v2200_v49 = vmul.f32 0.01, %v2152_v43  ;;  %v2155_v51 = vadd.f32 %v3477_v17, %v2154_v46  ;;  %v2156_v52 = vpop.f32.mrb[91].mxu1  ;;  %2518 = vmatpush3.bf16.xpose.msra.mxu0 %v2257_v48  ;;  %vm2184_vm2 = vcmp.gt.f32.partialorder %v2152_v43, 0.0 }
 0x64e   :  { %2519 = vmatprep.subr.bf16.mxu0 %v2883_v3 }
 0x64f   :  { %vm2185_vm1 = vcmp.gt.f32.partialorder %v2155_v51, 0.0  ;;  %v2201_v53 = vmul.f32 0.01, %v2155_v51  ;;  %v2216_v54 = vsel %vm2184_vm2, %v2152_v43, %v2200_v49 }
 0x651   :  { %v2217_v55 = vsel %vm2185_vm1, %v2155_v51, %v2201_v53 }
 0x652   :  { %v2159_v56 = vpop.f32.mrb[92].mxu1  ;;  %v2228_v57 = vpack.c.bf16 %v2217_v55, %v2216_v54 }
 0x653   :  { %v2160_v58 = vadd.f32 %v3477_v17, %v2159_v56  ;;  %v2161_v59 = vpop.f32.mrb[93].mxu1 }
 0x654   :  { %v2162_v60 = vpop.f32.mrb[94].mxu1  ;;  %v2260_v61 = vsel %vm1197_vm4, %v2228_v57, 0 }
 0x655   :  { %v2202_v62 = vmul.f32 0.01, %v2160_v58  ;;  %v2163_v63 = vadd.f32 %v3477_v17, %v2162_v60  ;;  %v2164_v13 = vpop.f32.mrb[95].mxu1  ;;  %2520 = vmatpush3.bf16.xpose.msra.mxu0 %v2260_v61  ;;  %vm2186_vm15 = vcmp.gt.f32.partialorder %v2160_v58, 0.0 }
 0x656   :  { %2521 = vmatprep.subr.bf16.mxu0 %v2883_v3 }
 0x657   :  { %vm2187_vm3 = vcmp.gt.f32.partialorder %v2163_v63, 0.0  ;;  %v2203_v14 = vmul.f32 0.01, %v2163_v63  ;;  %v2218_v0 = vsel %vm2186_vm15, %v2160_v58, %v2202_v62 }
 0x659   :  { %v2219_v1 = vsel %vm2187_vm3, %v2163_v63, %v2203_v14 }
 0x65a   :  { %v2167_v5 = vpop.f32.mrb[96].mxu1  ;;  %v2229_v6 = vpack.c.bf16 %v2219_v1, %v2218_v0 }
 0x65b   :  { %v2168_v7 = vadd.f32 %v3477_v17, %v2167_v5  ;;  %v2169_v8 = vpop.f32.mrb[97].mxu1 }
 0x65c   :  { %v2170_v11 = vpop.f32.mrb[98].mxu1  ;;  %v2263_v15 = vsel %vm1197_vm4, %v2229_v6, 0 }
 0x65d   :  { %v2204_v4 = vmul.f32 0.01, %v2168_v7  ;;  %v2171_v40 = vadd.f32 %v3477_v17, %v2170_v11  ;;  %v2172_v41 = vpop.f32.mrb[99].mxu1  ;;  %2522 = vmatpush3.bf16.xpose.msra.mxu0 %v2263_v15  ;;  %vm2188_vm5 = vcmp.gt.f32.partialorder %v2168_v7, 0.0  ;;  %v1191_v17 = vpop.permute.xlu0 %1190 }
 0x65e   :  { %2523 = vmatprep.subr.bf16.mxu0 %v2883_v3  ;;  %v1196_v19 = vrot.slane %v1191_v17, %v3178_v10  ;;  %v2308_v3 = vld [vmem:[%s3561_s8] sm:$0x1] }
 0x65f   :  { %vm2189_vm7 = vcmp.gt.f32.partialorder %v2171_v40, 0.0  ;;  %v2205_v16 = vmul.f32 0.01, %v2171_v40  ;;  %v2220_v18 = vsel %vm2188_vm5, %v2168_v7, %v2204_v4  ;;  %vm2309_vm8 = vcmp.gt.f32.partialorder %v2308_v3, 0.0 }
 0x660   :  { %v1260_v21 = vadd.f32 %v3370_v34, %v1196_v19 }
 0x661   :  { %v2221_v25 = vsel %vm2189_vm7, %v2171_v40, %v2205_v16  ;;  %v2235_v44 = vpop.permute.xlu0 %2234 }
 0x662   :  { %v2230_v32 = vpack.c.bf16 %v2221_v25, %v2220_v18  ;;  %v2240_v20 = vrot.slane %v2235_v44, %v3178_v10 }
 0x664   :  { %v2266_v39 = vsel %vm1197_vm4, %v2230_v32, 0 }
 0x665   :  { %2524 = vmatpush3.bf16.xpose.msra.mxu0 %v2266_v39 }
 0x66c   :  { %2526 = vmatmul.mubr.msk.bf16.vlgmr.msra.gmra.mrb[96].mxu0 %vm1197_vm4, %v2222_v2 }
 0x73f   :  { %v2302_v47 = vpop.f32.mrb[96].mxu0 }
 0x740   :  { %v2303_v50 = vadd.f32 %v2302_v47, %v2240_v20  ;;  %v2527_v22 = vpop.f32.mrb[97].mxu0 }
 0x741   :  { %v2305_v12 = vpop.f32.mrb[98].mxu0 }
 0x742   :  { %v2528_v23 = vpop.f32.mrb[99].mxu0  ;;  %v2310_v24 = vsel %vm2309_vm8, %v2303_v50, %v1260_v21 }
 0x743   :  { %2311 = vst [vmem:[#allocation18] sm:$0x1] %v2310_v24 }
 0x744   :  { %2847 = shalt.err (!%p2844_p12)
}
 0x745   :  { %s2848_s28 = scalar_lea.hbm %s3549_s18, 16 }
 0x746   :  { %p2849_p13 = scmp.ne.s32.totalorder %s3549_s18, %s2848_s28  ;;  %p2852_p0 = scmp.lt.u32.totalorder %s2848_s28, %s3549_s18 }
 0x748   :  { %p2854_p1 = pnand %p2852_p0, %p2849_p13 }
 0x74a   :  { %2857 = shalt.err (!%p2854_p1)
}
 0x74b   :  { %2321 = dma.vmem_to_hbm [thread:$0]  %s2319_s20, 16, %s3549_s18, [#allocation6]  }
 0x74c   :  { %2868 = dma.done.wait [#allocation6], 16  }
 0x74d   :  { %2869 = vsyncadd [#allocation6], 4294967280 }
 0x74e   :  { %2325 = vsyncpa [#allocation5], 1 }
 0x74f   :  { %2326 = vsyncpa [#allocation8], 1 }
 0x750   :  { %2327 = vsyncpa [#allocation11], 1 }
 0x751   :  { %2328 = vsyncpa [#allocation14], 1 }
 0x752   :  { %2329 = vsyncpa [#allocation17], 1 }
 0x753   :  { %2330 = vsyncpa [#allocation6], 1 }

</bundles_post_ra>
